<compile_context>
chip_gen: v7x
topology: tpu7x:2x2x1
jax: 0.10.0
libtpu: 0.0.40
codegen_flags: <defaults>
</compile_context>

<pallas_src>
import numpy as np

import jax
import jax.numpy as jnp
from jax.experimental import pallas as pl
from jax.experimental.pallas import tpu as pltpu

_BN_EPS = 1e-5
_PAD = 8  # tile-aligned zero rows in front of the length axis of VMEM scratch


# ---------------------------------------------------------------------------
# Fused Pallas kernel: deconv -> (concat) -> conv+BN+ReLU -> conv+BN+ReLU
# ---------------------------------------------------------------------------
def _up1d_kernel(x2p_ref, x1d_ref, wt_ref, bt_ref, w1a_ref, w1b_ref, gb1_ref,
                 w2_ref, gb2_ref, o_ref, up_ref, h1_ref):
    n, l2, cout = o_ref.shape
    chalf = up_ref.shape[-1]
    cmid = h1_ref.shape[-1]
    inv_cnt = 1.0 / float(n * l2)

    # Zero scratch: rows [0:_PAD) and row _PAD+l2 serve as the conv zero padding.
    up_ref[...] = jnp.zeros_like(up_ref)
    h1_ref[...] = jnp.zeros_like(h1_ref)

    # ---- stage 1: ConvTranspose1d(Cin -> Cin//2, k=2, s=2) on the MXU ----------
    # x1d has every time step duplicated, so output position p uses tap (p & 1).
    parity = jax.lax.broadcasted_iota(jnp.int32, (l2, 1), 0) & 1
    for b in range(n):
        xb = x1d_ref[b]                                               # (l2, cin) bf16
        u0 = jnp.dot(xb, wt_ref[0], preferred_element_type=jnp.float32)
        u1 = jnp.dot(xb, wt_ref[1], preferred_element_type=jnp.float32)
        up_ref[b, _PAD:_PAD + l2, :] = jnp.where(parity == 0, u0, u1) + bt_ref[...]

    # ---- stage 2: Conv1d(Cin -> Cmid, k=3, p=1) as 3 shifted-window matmuls ----
    # (channel concat [x2 | up] folded into the split weights w1a / w1b)
    pre1 = []
    s1 = jnp.zeros((1, cmid), jnp.float32)
    q1 = jnp.zeros((1, cmid), jnp.float32)
    for b in range(n):
        acc = jnp.zeros((l2, cmid), jnp.float32)
        for k in range(3):
            acc += jnp.dot(x2p_ref[b, k:k + l2, :], w1a_ref[k],
                           preferred_element_type=jnp.float32)
            acc += jnp.dot(
                up_ref[b, _PAD - 1 + k:_PAD - 1 + k + l2, :].astype(jnp.bfloat16),
                w1b_ref[k], preferred_element_type=jnp.float32)
        pre1.append(acc)
        s1 += jnp.sum(acc, axis=0, keepdims=True)
        q1 += jnp.sum(acc * acc, axis=0, keepdims=True)

    # BatchNorm1d (train-mode batch stats, biased variance) folded to scale/shift.
    m1 = s1 * inv_cnt
    v1 = jnp.maximum(q1 * inv_cnt - m1 * m1, 0.0)
    sc1 = gb1_ref[0:1, :] * jax.lax.rsqrt(v1 + _BN_EPS)
    sh1 = gb1_ref[1:2, :] - m1 * sc1
    for b in range(n):
        h1_ref[b, _PAD:_PAD + l2, :] = jnp.maximum(pre1[b] * sc1 + sh1, 0.0)

    # ---- stage 3: Conv1d(Cmid -> Cout, k=3, p=1) + BN + ReLU -------------------
    pre2 = []
    s2 = jnp.zeros((1, cout), jnp.float32)
    q2 = jnp.zeros((1, cout), jnp.float32)
    for b in range(n):
        acc = jnp.zeros((l2, cout), jnp.float32)
        for k in range(3):
            acc += jnp.dot(
                h1_ref[b, _PAD - 1 + k:_PAD - 1 + k + l2, :].astype(jnp.bfloat16),
                w2_ref[k], preferred_element_type=jnp.float32)
        pre2.append(acc)
        s2 += jnp.sum(acc, axis=0, keepdims=True)
        q2 += jnp.sum(acc * acc, axis=0, keepdims=True)

    m2 = s2 * inv_cnt
    v2 = jnp.maximum(q2 * inv_cnt - m2 * m2, 0.0)
    sc2 = gb2_ref[0:1, :] * jax.lax.rsqrt(v2 + _BN_EPS)
    sh2 = gb2_ref[1:2, :] - m2 * sc2
    for b in range(n):
        o_ref[b, :, :] = jnp.maximum(pre2[b] * sc2 + sh2, 0.0)


# ---------------------------------------------------------------------------
# Wrapper: layout glue only (transposes, duplication, padding, weight repack)
# ---------------------------------------------------------------------------
@jax.jit
def up_1d_forward(x1, x2, params):
    """x1: (N, Cin, L1), x2: (N, Cin//2, 2*L1) -> (N, Cout, 2*L1)."""
    n, cin, l1 = x1.shape
    chalf = cin // 2
    l2 = 2 * l1
    cmid = params["w1"].shape[0]
    cout = params["w2"].shape[0]

    # Lane-dense NWC activations (bf16 MXU operands).
    x1_nwc = jnp.transpose(x1, (0, 2, 1))                               # (n, l1, cin)
    x1d = jnp.repeat(x1_nwc, 2, axis=1).astype(jnp.bfloat16)            # (n, l2, cin)
    x2p = jnp.pad(jnp.transpose(x2, (0, 2, 1)),
                  ((0, 0), (1, 1), (0, 0))).astype(jnp.bfloat16)        # (n, l2+2, chalf)

    # Weight repack (done once, in XLA): per-tap matrices in (Cin, Cout) form.
    wt = jnp.transpose(params["wt"], (2, 0, 1)).astype(jnp.bfloat16)    # (2, cin, chalf)
    bt = params["bt"].reshape(1, chalf).astype(jnp.float32)
    w1 = jnp.transpose(params["w1"], (2, 1, 0))                         # (3, cin, cmid)
    w1a = w1[:, :chalf, :].astype(jnp.bfloat16)                         # acts on x2
    w1b = w1[:, chalf:, :].astype(jnp.bfloat16)                         # acts on up(x1)
    gb1 = jnp.stack([params["g1"], params["b1"]]).astype(jnp.float32)   # (2, cmid)
    w2 = jnp.transpose(params["w2"], (2, 1, 0)).astype(jnp.bfloat16)    # (3, cmid, cout)
    gb2 = jnp.stack([params["g2"], params["b2"]]).astype(jnp.float32)   # (2, cout)
    # NOTE: conv biases b1c/b2c cancel exactly under batch-stat BatchNorm -> not passed.

    vmem = pl.BlockSpec(memory_space=pltpu.MemorySpace.VMEM)
    out_nwc = pl.pallas_call(
        _up1d_kernel,
        out_shape=jax.ShapeDtypeStruct((n, l2, cout), jnp.float32),
        in_specs=[vmem] * 9,
        out_specs=vmem,
        scratch_shapes=[
            pltpu.VMEM((n, l2 + _PAD + 1, chalf), jnp.float32),   # padded deconv output
            pltpu.VMEM((n, l2 + _PAD + 1, cmid), jnp.float32),    # padded conv1 output
        ],
    )(x2p, x1d, wt, bt, w1a, w1b, gb1, w2, gb2)

    return jnp.transpose(out_nwc, (0, 2, 1))                            # back to NCW


# ---------------------------------------------------------------------------
# Pure-JAX f32 reference (mirrors the PyTorch module, incl. the cancelled biases)
# ---------------------------------------------------------------------------
def _reference_forward(x1, x2, p):
    n, cin, l1 = x1.shape
    chalf = cin // 2
    up = jnp.einsum("ncl,cok->nolk", x1, p["wt"]).reshape(n, chalf, 2 * l1)
    up = up + p["bt"][None, :, None]
    x = jnp.concatenate([x2, up], axis=1)

    def conv1d_k3p1(x, w, b):
        n_, _, l_ = x.shape
        xp = jnp.pad(x, ((0, 0), (0, 0), (1, 1)))
        y = jnp.zeros((n_, w.shape[0], l_), jnp.float32) + b[None, :, None]
        for k in range(3):
            y = y + jnp.einsum("ncl,dc->ndl", xp[:, :, k:k + l_], w[:, :, k])
        return y

    def bn_relu(y, g, beta):
        mean = jnp.mean(y, axis=(0, 2), keepdims=True)
        var = jnp.mean((y - mean) ** 2, axis=(0, 2), keepdims=True)
        yh = (y - mean) * jax.lax.rsqrt(var + _BN_EPS)
        return jnp.maximum(g[None, :, None] * yh + beta[None, :, None], 0.0)

    h = bn_relu(conv1d_k3p1(x, p["w1"], p["b1c"]), p["g1"], p["b1"])
    return bn_relu(conv1d_k3p1(h, p["w2"], p["b2c"]), p["g2"], p["b2"])


# ---------------------------------------------------------------------------
if __name__ == "__main__":
    key = jax.random.PRNGKey(0)
    ks = jax.random.split(key, 12)

    # Up_1D(in_channels=64, out_channels=32, bilinear=False)
    n, cin, l1 = 2, 64, 8
    cout = 32
    chalf, cmid, l2 = cin // 2, cout, 2 * l1

    x1 = jax.random.normal(ks[0], (n, cin, l1), jnp.float32)
    x2 = jax.random.normal(ks[1], (n, chalf, l2), jnp.float32)

    params = dict(
        wt=0.10 * jax.random.normal(ks[2], (cin, chalf, 2), jnp.float32),   # ConvTranspose1d.weight
        bt=0.10 * jax.random.normal(ks[3], (chalf,), jnp.float32),          # ConvTranspose1d.bias
        w1=0.05 * jax.random.normal(ks[4], (cmid, cin, 3), jnp.float32),    # Conv1d #1 weight
        b1c=0.10 * jax.random.normal(ks[5], (cmid,), jnp.float32),          # Conv1d #1 bias (cancels in BN)
        g1=1.0 + 0.1 * jax.random.normal(ks[6], (cmid,), jnp.float32),      # BN #1 gamma
        b1=0.10 * jax.random.normal(ks[7], (cmid,), jnp.float32),           # BN #1 beta
        w2=0.05 * jax.random.normal(ks[8], (cout, cmid, 3), jnp.float32),   # Conv1d #2 weight
        b2c=0.10 * jax.random.normal(ks[9], (cout,), jnp.float32),          # Conv1d #2 bias (cancels in BN)
        g2=1.0 + 0.1 * jax.random.normal(ks[10], (cout,), jnp.float32),     # BN #2 gamma
        b2=0.10 * jax.random.normal(ks[11], (cout,), jnp.float32),          # BN #2 beta
    )

    out = jax.block_until_ready(up_1d_forward(x1, x2, params))
    assert out.shape == (n, cout, l2), out.shape
    assert bool(jnp.all(jnp.isfinite(out)))

    # Loose tolerance: the kernel uses bf16 MXU operands with f32 accumulation.
    ref = jax.block_until_ready(_reference_forward(x1, x2, params))
    np.testing.assert_allclose(np.asarray(out), np.asarray(ref), rtol=1e-1, atol=1e-1)

    print("KERNEL_OK")
</pallas_src>

<mosaic_0001>
module attributes {stable_mosaic.version = 11 : i64} {
  func.func @_up1d_kernel(%arg0: memref<2x18x32xbf16, #tpu.memory_space<vmem>>, %arg1: memref<2x16x64xbf16, #tpu.memory_space<vmem>>, %arg2: memref<2x64x32xbf16, #tpu.memory_space<vmem>>, %arg3: memref<1x32xf32, #tpu.memory_space<vmem>>, %arg4: memref<3x32x32xbf16, #tpu.memory_space<vmem>>, %arg5: memref<3x32x32xbf16, #tpu.memory_space<vmem>>, %arg6: memref<2x32xf32, #tpu.memory_space<vmem>>, %arg7: memref<3x32x32xbf16, #tpu.memory_space<vmem>>, %arg8: memref<2x32xf32, #tpu.memory_space<vmem>>, %arg9: memref<2x16x32xf32, #tpu.memory_space<vmem>>, %arg10: memref<2x25x32xf32, #tpu.memory_space<vmem>>, %arg11: memref<2x25x32xf32, #tpu.memory_space<vmem>>) attributes {dimension_semantics = [], scalar_prefetch = 0 : i64, scratch_operands = 2 : i64, tpu.core_type = #tpu.core_type<tc>} {
    %cst = arith.constant 0.000000e+00 : f32
    %0 = vector.broadcast %cst : f32 to vector<2x25x32xf32>
    %c0 = arith.constant 0 : index
    %c0_0 = arith.constant 0 : index
    %c0_1 = arith.constant 0 : index
    %1 = vector.load %arg10[%c0, %c0_0, %c0_1] : memref<2x25x32xf32, #tpu.memory_space<vmem>>, vector<2x25x32xf32>
    tpu.vector_store %arg10[%c0, %c0_0, %c0_1], %0 {strides = array<i32>} : memref<2x25x32xf32, #tpu.memory_space<vmem>>, vector<2x25x32xf32>,
    %cst_2 = arith.constant 0.000000e+00 : f32
    %2 = vector.broadcast %cst_2 : f32 to vector<2x25x32xf32>
    %c0_3 = arith.constant 0 : index
    %c0_4 = arith.constant 0 : index
    %c0_5 = arith.constant 0 : index
    %3 = vector.load %arg11[%c0_3, %c0_4, %c0_5] : memref<2x25x32xf32, #tpu.memory_space<vmem>>, vector<2x25x32xf32>
    tpu.vector_store %arg11[%c0_3, %c0_4, %c0_5], %2 {strides = array<i32>} : memref<2x25x32xf32, #tpu.memory_space<vmem>>, vector<2x25x32xf32>,
    %4 = tpu.iota {dimensions = array<i32: 0>} : vector<16x1xi32>
    %c1_i32 = arith.constant 1 : i32
    %5 = vector.broadcast %c1_i32 : i32 to vector<16x1xi32>
    %6 = arith.andi %4, %5 : vector<16x1xi32>
    %c0_6 = arith.constant 0 : index
    %c0_7 = arith.constant 0 : index
    %c0_8 = arith.constant 0 : index
    %7 = vector.load %arg1[%c0_6, %c0_7, %c0_8] : memref<2x16x64xbf16, #tpu.memory_space<vmem>>, vector<1x16x64xbf16>
    %8 = vector.shape_cast %7 : vector<1x16x64xbf16> to vector<16x64xbf16>
    %c0_9 = arith.constant 0 : index
    %c0_10 = arith.constant 0 : index
    %c0_11 = arith.constant 0 : index
    %9 = vector.load %arg2[%c0_9, %c0_10, %c0_11] : memref<2x64x32xbf16, #tpu.memory_space<vmem>>, vector<1x64x32xbf16>
    %10 = vector.shape_cast %9 : vector<1x64x32xbf16> to vector<64x32xbf16>
    %cst_12 = arith.constant dense<0.000000e+00> : vector<16x32xf32>
    %11 = tpu.matmul %8, %10, %cst_12 {dimension_numbers = #tpu.dot_dimension_numbers<[1], [0], [0], [1], [0, 0, 1, 1], [], []>} : vector<16x64xbf16>, vector<64x32xbf16>, vector<16x32xf32> -> vector<16x32xf32>
    %c1 = arith.constant 1 : index
    %c0_13 = arith.constant 0 : index
    %c0_14 = arith.constant 0 : index
    %12 = vector.load %arg2[%c1, %c0_13, %c0_14] : memref<2x64x32xbf16, #tpu.memory_space<vmem>>, vector<1x64x32xbf16>
    %13 = vector.shape_cast %12 : vector<1x64x32xbf16> to vector<64x32xbf16>
    %cst_15 = arith.constant dense<0.000000e+00> : vector<16x32xf32>
    %14 = tpu.matmul %8, %13, %cst_15 {dimension_numbers = #tpu.dot_dimension_numbers<[1], [0], [0], [1], [0, 0, 1, 1], [], []>} : vector<16x64xbf16>, vector<64x32xbf16>, vector<16x32xf32> -> vector<16x32xf32>
    %c0_i32 = arith.constant 0 : i32
    %15 = vector.broadcast %c0_i32 : i32 to vector<16x1xi32>
    %16 = arith.cmpi eq, %6, %15 : vector<16x1xi32>
    %17 = vector.shape_cast %16 : vector<16x1xi1> to vector<16x1xi1>
    %18 = vector.broadcast %17 : vector<16x1xi1> to vector<16x32xi1>
    %19 = arith.select %18, %11, %14 : vector<16x32xi1>, vector<16x32xf32>
    %c0_16 = arith.constant 0 : index
    %c0_17 = arith.constant 0 : index
    %20 = vector.load %arg3[%c0_16, %c0_17] : memref<1x32xf32, #tpu.memory_space<vmem>>, vector<1x32xf32>
    %21 = vector.broadcast %20 : vector<1x32xf32> to vector<16x32xf32>
    %22 = arith.addf %19, %21 : vector<16x32xf32>
    %c0_18 = arith.constant 0 : index
    %c8 = arith.constant 8 : index
    %c0_19 = arith.constant 0 : index
    %23 = vector.load %arg10[%c0_18, %c8, %c0_19] : memref<2x25x32xf32, #tpu.memory_space<vmem>>, vector<1x16x32xf32>
    %24 = vector.shape_cast %23 : vector<1x16x32xf32> to vector<16x32xf32>
    %25 = vector.shape_cast %22 : vector<16x32xf32> to vector<1x16x32xf32>
    tpu.vector_store %arg10[%c0_18, %c8, %c0_19], %25 {strides = array<i32>} : memref<2x25x32xf32, #tpu.memory_space<vmem>>, vector<1x16x32xf32>,
    %c1_20 = arith.constant 1 : index
    %c0_21 = arith.constant 0 : index
    %c0_22 = arith.constant 0 : index
    %26 = vector.load %arg1[%c1_20, %c0_21, %c0_22] : memref<2x16x64xbf16, #tpu.memory_space<vmem>>, vector<1x16x64xbf16>
    %27 = vector.shape_cast %26 : vector<1x16x64xbf16> to vector<16x64xbf16>
    %c0_23 = arith.constant 0 : index
    %c0_24 = arith.constant 0 : index
    %c0_25 = arith.constant 0 : index
    %28 = vector.load %arg2[%c0_23, %c0_24, %c0_25] : memref<2x64x32xbf16, #tpu.memory_space<vmem>>, vector<1x64x32xbf16>
    %29 = vector.shape_cast %28 : vector<1x64x32xbf16> to vector<64x32xbf16>
    %cst_26 = arith.constant dense<0.000000e+00> : vector<16x32xf32>
    %30 = tpu.matmul %27, %29, %cst_26 {dimension_numbers = #tpu.dot_dimension_numbers<[1], [0], [0], [1], [0, 0, 1, 1], [], []>} : vector<16x64xbf16>, vector<64x32xbf16>, vector<16x32xf32> -> vector<16x32xf32>
    %c1_27 = arith.constant 1 : index
    %c0_28 = arith.constant 0 : index
    %c0_29 = arith.constant 0 : index
    %31 = vector.load %arg2[%c1_27, %c0_28, %c0_29] : memref<2x64x32xbf16, #tpu.memory_space<vmem>>, vector<1x64x32xbf16>
    %32 = vector.shape_cast %31 : vector<1x64x32xbf16> to vector<64x32xbf16>
    %cst_30 = arith.constant dense<0.000000e+00> : vector<16x32xf32>
    %33 = tpu.matmul %27, %32, %cst_30 {dimension_numbers = #tpu.dot_dimension_numbers<[1], [0], [0], [1], [0, 0, 1, 1], [], []>} : vector<16x64xbf16>, vector<64x32xbf16>, vector<16x32xf32> -> vector<16x32xf32>
    %c0_i32_31 = arith.constant 0 : i32
    %34 = vector.broadcast %c0_i32_31 : i32 to vector<16x1xi32>
    %35 = arith.cmpi eq, %6, %34 : vector<16x1xi32>
    %36 = vector.shape_cast %35 : vector<16x1xi1> to vector<16x1xi1>
    %37 = vector.broadcast %36 : vector<16x1xi1> to vector<16x32xi1>
    %38 = arith.select %37, %30, %33 : vector<16x32xi1>, vector<16x32xf32>
    %c0_32 = arith.constant 0 : index
    %c0_33 = arith.constant 0 : index
    %39 = vector.load %arg3[%c0_32, %c0_33] : memref<1x32xf32, #tpu.memory_space<vmem>>, vector<1x32xf32>
    %40 = vector.broadcast %39 : vector<1x32xf32> to vector<16x32xf32>
    %41 = arith.addf %38, %40 : vector<16x32xf32>
    %c1_34 = arith.constant 1 : index
    %c8_35 = arith.constant 8 : index
    %c0_36 = arith.constant 0 : index
    %42 = vector.load %arg10[%c1_34, %c8_35, %c0_36] : memref<2x25x32xf32, #tpu.memory_space<vmem>>, vector<1x16x32xf32>
    %43 = vector.shape_cast %42 : vector<1x16x32xf32> to vector<16x32xf32>
    %44 = vector.shape_cast %41 : vector<16x32xf32> to vector<1x16x32xf32>
    tpu.vector_store %arg10[%c1_34, %c8_35, %c0_36], %44 {strides = array<i32>} : memref<2x25x32xf32, #tpu.memory_space<vmem>>, vector<1x16x32xf32>,
    %cst_37 = arith.constant 0.000000e+00 : f32
    %45 = vector.broadcast %cst_37 : f32 to vector<1x32xf32>
    %cst_38 = arith.constant 0.000000e+00 : f32
    %46 = vector.broadcast %cst_38 : f32 to vector<1x32xf32>
    %cst_39 = arith.constant 0.000000e+00 : f32
    %47 = vector.broadcast %cst_39 : f32 to vector<16x32xf32>
    %c0_40 = arith.constant 0 : index
    %c0_41 = arith.constant 0 : index
    %c0_42 = arith.constant 0 : index
    %48 = vector.load %arg0[%c0_40, %c0_41, %c0_42] : memref<2x18x32xbf16, #tpu.memory_space<vmem>>, vector<1x16x32xbf16>
    %49 = vector.shape_cast %48 : vector<1x16x32xbf16> to vector<16x32xbf16>
    %c0_43 = arith.constant 0 : index
    %c0_44 = arith.constant 0 : index
    %c0_45 = arith.constant 0 : index
    %50 = vector.load %arg4[%c0_43, %c0_44, %c0_45] : memref<3x32x32xbf16, #tpu.memory_space<vmem>>, vector<1x32x32xbf16>
    %51 = vector.shape_cast %50 : vector<1x32x32xbf16> to vector<32x32xbf16>
    %cst_46 = arith.constant dense<0.000000e+00> : vector<16x32xf32>
    %52 = tpu.matmul %49, %51, %cst_46 {dimension_numbers = #tpu.dot_dimension_numbers<[1], [0], [0], [1], [0, 0, 1, 1], [], []>} : vector<16x32xbf16>, vector<32x32xbf16>, vector<16x32xf32> -> vector<16x32xf32>
    %53 = arith.addf %47, %52 : vector<16x32xf32>
    %c0_47 = arith.constant 0 : index
    %c7 = arith.constant 7 : index
    %c0_48 = arith.constant 0 : index
    %54 = vector.load %arg10[%c0_47, %c7, %c0_48] : memref<2x25x32xf32, #tpu.memory_space<vmem>>, vector<1x16x32xf32>
    %55 = vector.shape_cast %54 : vector<1x16x32xf32> to vector<16x32xf32>
    %56 = arith.truncf %55 : vector<16x32xf32> to vector<16x32xbf16>
    %c0_49 = arith.constant 0 : index
    %c0_50 = arith.constant 0 : index
    %c0_51 = arith.constant 0 : index
    %57 = vector.load %arg5[%c0_49, %c0_50, %c0_51] : memref<3x32x32xbf16, #tpu.memory_space<vmem>>, vector<1x32x32xbf16>
    %58 = vector.shape_cast %57 : vector<1x32x32xbf16> to vector<32x32xbf16>
    %cst_52 = arith.constant dense<0.000000e+00> : vector<16x32xf32>
    %59 = tpu.matmul %56, %58, %cst_52 {dimension_numbers = #tpu.dot_dimension_numbers<[1], [0], [0], [1], [0, 0, 1, 1], [], []>} : vector<16x32xbf16>, vector<32x32xbf16>, vector<16x32xf32> -> vector<16x32xf32>
    %60 = arith.addf %53, %59 : vector<16x32xf32>
    %c0_53 = arith.constant 0 : index
    %c1_54 = arith.constant 1 : index
    %c0_55 = arith.constant 0 : index
    %61 = vector.load %arg0[%c0_53, %c1_54, %c0_55] : memref<2x18x32xbf16, #tpu.memory_space<vmem>>, vector<1x16x32xbf16>
    %62 = vector.shape_cast %61 : vector<1x16x32xbf16> to vector<16x32xbf16>
    %c1_56 = arith.constant 1 : index
    %c0_57 = arith.constant 0 : index
    %c0_58 = arith.constant 0 : index
    %63 = vector.load %arg4[%c1_56, %c0_57, %c0_58] : memref<3x32x32xbf16, #tpu.memory_space<vmem>>, vector<1x32x32xbf16>
    %64 = vector.shape_cast %63 : vector<1x32x32xbf16> to vector<32x32xbf16>
    %cst_59 = arith.constant dense<0.000000e+00> : vector<16x32xf32>
    %65 = tpu.matmul %62, %64, %cst_59 {dimension_numbers = #tpu.dot_dimension_numbers<[1], [0], [0], [1], [0, 0, 1, 1], [], []>} : vector<16x32xbf16>, vector<32x32xbf16>, vector<16x32xf32> -> vector<16x32xf32>
    %66 = arith.addf %60, %65 : vector<16x32xf32>
    %c0_60 = arith.constant 0 : index
    %c8_61 = arith.constant 8 : index
    %c0_62 = arith.constant 0 : index
    %67 = vector.load %arg10[%c0_60, %c8_61, %c0_62] : memref<2x25x32xf32, #tpu.memory_space<vmem>>, vector<1x16x32xf32>
    %68 = vector.shape_cast %67 : vector<1x16x32xf32> to vector<16x32xf32>
    %69 = arith.truncf %68 : vector<16x32xf32> to vector<16x32xbf16>
    %c1_63 = arith.constant 1 : index
    %c0_64 = arith.constant 0 : index
    %c0_65 = arith.constant 0 : index
    %70 = vector.load %arg5[%c1_63, %c0_64, %c0_65] : memref<3x32x32xbf16, #tpu.memory_space<vmem>>, vector<1x32x32xbf16>
    %71 = vector.shape_cast %70 : vector<1x32x32xbf16> to vector<32x32xbf16>
    %cst_66 = arith.constant dense<0.000000e+00> : vector<16x32xf32>
    %72 = tpu.matmul %69, %71, %cst_66 {dimension_numbers = #tpu.dot_dimension_numbers<[1], [0], [0], [1], [0, 0, 1, 1], [], []>} : vector<16x32xbf16>, vector<32x32xbf16>, vector<16x32xf32> -> vector<16x32xf32>
    %73 = arith.addf %66, %72 : vector<16x32xf32>
    %c0_67 = arith.constant 0 : index
    %c2 = arith.constant 2 : index
    %c0_68 = arith.constant 0 : index
    %74 = vector.load %arg0[%c0_67, %c2, %c0_68] : memref<2x18x32xbf16, #tpu.memory_space<vmem>>, vector<1x16x32xbf16>
    %75 = vector.shape_cast %74 : vector<1x16x32xbf16> to vector<16x32xbf16>
    %c2_69 = arith.constant 2 : index
    %c0_70 = arith.constant 0 : index
    %c0_71 = arith.constant 0 : index
    %76 = vector.load %arg4[%c2_69, %c0_70, %c0_71] : memref<3x32x32xbf16, #tpu.memory_space<vmem>>, vector<1x32x32xbf16>
    %77 = vector.shape_cast %76 : vector<1x32x32xbf16> to vector<32x32xbf16>
    %cst_72 = arith.constant dense<0.000000e+00> : vector<16x32xf32>
    %78 = tpu.matmul %75, %77, %cst_72 {dimension_numbers = #tpu.dot_dimension_numbers<[1], [0], [0], [1], [0, 0, 1, 1], [], []>} : vector<16x32xbf16>, vector<32x32xbf16>, vector<16x32xf32> -> vector<16x32xf32>
    %79 = arith.addf %73, %78 : vector<16x32xf32>
    %c0_73 = arith.constant 0 : index
    %c9 = arith.constant 9 : index
    %c0_74 = arith.constant 0 : index
    %80 = vector.load %arg10[%c0_73, %c9, %c0_74] : memref<2x25x32xf32, #tpu.memory_space<vmem>>, vector<1x16x32xf32>
    %81 = vector.shape_cast %80 : vector<1x16x32xf32> to vector<16x32xf32>
    %82 = arith.truncf %81 : vector<16x32xf32> to vector<16x32xbf16>
    %c2_75 = arith.constant 2 : index
    %c0_76 = arith.constant 0 : index
    %c0_77 = arith.constant 0 : index
    %83 = vector.load %arg5[%c2_75, %c0_76, %c0_77] : memref<3x32x32xbf16, #tpu.memory_space<vmem>>, vector<1x32x32xbf16>
    %84 = vector.shape_cast %83 : vector<1x32x32xbf16> to vector<32x32xbf16>
    %cst_78 = arith.constant dense<0.000000e+00> : vector<16x32xf32>
    %85 = tpu.matmul %82, %84, %cst_78 {dimension_numbers = #tpu.dot_dimension_numbers<[1], [0], [0], [1], [0, 0, 1, 1], [], []>} : vector<16x32xbf16>, vector<32x32xbf16>, vector<16x32xf32> -> vector<16x32xf32>
    %86 = arith.addf %79, %85 : vector<16x32xf32>
    %cst_79 = arith.constant dense<0.000000e+00> : vector<32xf32>
    %87 = vector.multi_reduction <add>, %86, %cst_79 [0] : vector<16x32xf32> to vector<32xf32>
    %88 = vector.shape_cast %87 : vector<32xf32> to vector<1x32xf32>
    %89 = arith.addf %45, %88 : vector<1x32xf32>
    %90 = arith.mulf %86, %86 : vector<16x32xf32>
    %cst_80 = arith.constant dense<0.000000e+00> : vector<32xf32>
    %91 = vector.multi_reduction <add>, %90, %cst_80 [0] : vector<16x32xf32> to vector<32xf32>
    %92 = vector.shape_cast %91 : vector<32xf32> to vector<1x32xf32>
    %93 = arith.addf %46, %92 : vector<1x32xf32>
    %cst_81 = arith.constant 0.000000e+00 : f32
    %94 = vector.broadcast %cst_81 : f32 to vector<16x32xf32>
    %c1_82 = arith.constant 1 : index
    %c0_83 = arith.constant 0 : index
    %c0_84 = arith.constant 0 : index
    %95 = vector.load %arg0[%c1_82, %c0_83, %c0_84] : memref<2x18x32xbf16, #tpu.memory_space<vmem>>, vector<1x16x32xbf16>
    %96 = vector.shape_cast %95 : vector<1x16x32xbf16> to vector<16x32xbf16>
    %c0_85 = arith.constant 0 : index
    %c0_86 = arith.constant 0 : index
    %c0_87 = arith.constant 0 : index
    %97 = vector.load %arg4[%c0_85, %c0_86, %c0_87] : memref<3x32x32xbf16, #tpu.memory_space<vmem>>, vector<1x32x32xbf16>
    %98 = vector.shape_cast %97 : vector<1x32x32xbf16> to vector<32x32xbf16>
    %cst_88 = arith.constant dense<0.000000e+00> : vector<16x32xf32>
    %99 = tpu.matmul %96, %98, %cst_88 {dimension_numbers = #tpu.dot_dimension_numbers<[1], [0], [0], [1], [0, 0, 1, 1], [], []>} : vector<16x32xbf16>, vector<32x32xbf16>, vector<16x32xf32> -> vector<16x32xf32>
    %100 = arith.addf %94, %99 : vector<16x32xf32>
    %c1_89 = arith.constant 1 : index
    %c7_90 = arith.constant 7 : index
    %c0_91 = arith.constant 0 : index
    %101 = vector.load %arg10[%c1_89, %c7_90, %c0_91] : memref<2x25x32xf32, #tpu.memory_space<vmem>>, vector<1x16x32xf32>
    %102 = vector.shape_cast %101 : vector<1x16x32xf32> to vector<16x32xf32>
    %103 = arith.truncf %102 : vector<16x32xf32> to vector<16x32xbf16>
    %c0_92 = arith.constant 0 : index
    %c0_93 = arith.constant 0 : index
    %c0_94 = arith.constant 0 : index
    %104 = vector.load %arg5[%c0_92, %c0_93, %c0_94] : memref<3x32x32xbf16, #tpu.memory_space<vmem>>, vector<1x32x32xbf16>
    %105 = vector.shape_cast %104 : vector<1x32x32xbf16> to vector<32x32xbf16>
    %cst_95 = arith.constant dense<0.000000e+00> : vector<16x32xf32>
    %106 = tpu.matmul %103, %105, %cst_95 {dimension_numbers = #tpu.dot_dimension_numbers<[1], [0], [0], [1], [0, 0, 1, 1], [], []>} : vector<16x32xbf16>, vector<32x32xbf16>, vector<16x32xf32> -> vector<16x32xf32>
    %107 = arith.addf %100, %106 : vector<16x32xf32>
    %c1_96 = arith.constant 1 : index
    %c1_97 = arith.constant 1 : index
    %c0_98 = arith.constant 0 : index
    %108 = vector.load %arg0[%c1_96, %c1_97, %c0_98] : memref<2x18x32xbf16, #tpu.memory_space<vmem>>, vector<1x16x32xbf16>
    %109 = vector.shape_cast %108 : vector<1x16x32xbf16> to vector<16x32xbf16>
    %c1_99 = arith.constant 1 : index
    %c0_100 = arith.constant 0 : index
    %c0_101 = arith.constant 0 : index
    %110 = vector.load %arg4[%c1_99, %c0_100, %c0_101] : memref<3x32x32xbf16, #tpu.memory_space<vmem>>, vector<1x32x32xbf16>
    %111 = vector.shape_cast %110 : vector<1x32x32xbf16> to vector<32x32xbf16>
    %cst_102 = arith.constant dense<0.000000e+00> : vector<16x32xf32>
    %112 = tpu.matmul %109, %111, %cst_102 {dimension_numbers = #tpu.dot_dimension_numbers<[1], [0], [0], [1], [0, 0, 1, 1], [], []>} : vector<16x32xbf16>, vector<32x32xbf16>, vector<16x32xf32> -> vector<16x32xf32>
    %113 = arith.addf %107, %112 : vector<16x32xf32>
    %c1_103 = arith.constant 1 : index
    %c8_104 = arith.constant 8 : index
    %c0_105 = arith.constant 0 : index
    %114 = vector.load %arg10[%c1_103, %c8_104, %c0_105] : memref<2x25x32xf32, #tpu.memory_space<vmem>>, vector<1x16x32xf32>
    %115 = vector.shape_cast %114 : vector<1x16x32xf32> to vector<16x32xf32>
    %116 = arith.truncf %115 : vector<16x32xf32> to vector<16x32xbf16>
    %c1_106 = arith.constant 1 : index
    %c0_107 = arith.constant 0 : index
    %c0_108 = arith.constant 0 : index
    %117 = vector.load %arg5[%c1_106, %c0_107, %c0_108] : memref<3x32x32xbf16, #tpu.memory_space<vmem>>, vector<1x32x32xbf16>
    %118 = vector.shape_cast %117 : vector<1x32x32xbf16> to vector<32x32xbf16>
    %cst_109 = arith.constant dense<0.000000e+00> : vector<16x32xf32>
    %119 = tpu.matmul %116, %118, %cst_109 {dimension_numbers = #tpu.dot_dimension_numbers<[1], [0], [0], [1], [0, 0, 1, 1], [], []>} : vector<16x32xbf16>, vector<32x32xbf16>, vector<16x32xf32> -> vector<16x32xf32>
    %120 = arith.addf %113, %119 : vector<16x32xf32>
    %c1_110 = arith.constant 1 : index
    %c2_111 = arith.constant 2 : index
    %c0_112 = arith.constant 0 : index
    %121 = vector.load %arg0[%c1_110, %c2_111, %c0_112] : memref<2x18x32xbf16, #tpu.memory_space<vmem>>, vector<1x16x32xbf16>
    %122 = vector.shape_cast %121 : vector<1x16x32xbf16> to vector<16x32xbf16>
    %c2_113 = arith.constant 2 : index
    %c0_114 = arith.constant 0 : index
    %c0_115 = arith.constant 0 : index
    %123 = vector.load %arg4[%c2_113, %c0_114, %c0_115] : memref<3x32x32xbf16, #tpu.memory_space<vmem>>, vector<1x32x32xbf16>
    %124 = vector.shape_cast %123 : vector<1x32x32xbf16> to vector<32x32xbf16>
    %cst_116 = arith.constant dense<0.000000e+00> : vector<16x32xf32>
    %125 = tpu.matmul %122, %124, %cst_116 {dimension_numbers = #tpu.dot_dimension_numbers<[1], [0], [0], [1], [0, 0, 1, 1], [], []>} : vector<16x32xbf16>, vector<32x32xbf16>, vector<16x32xf32> -> vector<16x32xf32>
    %126 = arith.addf %120, %125 : vector<16x32xf32>
    %c1_117 = arith.constant 1 : index
    %c9_118 = arith.constant 9 : index
    %c0_119 = arith.constant 0 : index
    %127 = vector.load %arg10[%c1_117, %c9_118, %c0_119] : memref<2x25x32xf32, #tpu.memory_space<vmem>>, vector<1x16x32xf32>
    %128 = vector.shape_cast %127 : vector<1x16x32xf32> to vector<16x32xf32>
    %129 = arith.truncf %128 : vector<16x32xf32> to vector<16x32xbf16>
    %c2_120 = arith.constant 2 : index
    %c0_121 = arith.constant 0 : index
    %c0_122 = arith.constant 0 : index
    %130 = vector.load %arg5[%c2_120, %c0_121, %c0_122] : memref<3x32x32xbf16, #tpu.memory_space<vmem>>, vector<1x32x32xbf16>
    %131 = vector.shape_cast %130 : vector<1x32x32xbf16> to vector<32x32xbf16>
    %cst_123 = arith.constant dense<0.000000e+00> : vector<16x32xf32>
    %132 = tpu.matmul %129, %131, %cst_123 {dimension_numbers = #tpu.dot_dimension_numbers<[1], [0], [0], [1], [0, 0, 1, 1], [], []>} : vector<16x32xbf16>, vector<32x32xbf16>, vector<16x32xf32> -> vector<16x32xf32>
    %133 = arith.addf %126, %132 : vector<16x32xf32>
    %cst_124 = arith.constant dense<0.000000e+00> : vector<32xf32>
    %134 = vector.multi_reduction <add>, %133, %cst_124 [0] : vector<16x32xf32> to vector<32xf32>
    %135 = vector.shape_cast %134 : vector<32xf32> to vector<1x32xf32>
    %136 = arith.addf %89, %135 : vector<1x32xf32>
    %137 = arith.mulf %133, %133 : vector<16x32xf32>
    %cst_125 = arith.constant dense<0.000000e+00> : vector<32xf32>
    %138 = vector.multi_reduction <add>, %137, %cst_125 [0] : vector<16x32xf32> to vector<32xf32>
    %139 = vector.shape_cast %138 : vector<32xf32> to vector<1x32xf32>
    %140 = arith.addf %93, %139 : vector<1x32xf32>
    %cst_126 = arith.constant 3.125000e-02 : f32
    %141 = vector.broadcast %cst_126 : f32 to vector<1x32xf32>
    %142 = arith.mulf %136, %141 : vector<1x32xf32>
    %cst_127 = arith.constant 3.125000e-02 : f32
    %143 = vector.broadcast %cst_127 : f32 to vector<1x32xf32>
    %144 = arith.mulf %140, %143 : vector<1x32xf32>
    %145 = arith.mulf %142, %142 : vector<1x32xf32>
    %146 = arith.subf %144, %145 : vector<1x32xf32>
    %cst_128 = arith.constant 0.000000e+00 : f32
    %147 = vector.broadcast %cst_128 : f32 to vector<1x32xf32>
    %148 = arith.maximumf %146, %147 : vector<1x32xf32>
    %c0_129 = arith.constant 0 : index
    %c0_130 = arith.constant 0 : index
    %149 = vector.load %arg6[%c0_129, %c0_130] : memref<2x32xf32, #tpu.memory_space<vmem>>, vector<1x32xf32>
    %cst_131 = arith.constant 9.99999974E-6 : f32
    %150 = vector.broadcast %cst_131 : f32 to vector<1x32xf32>
    %151 = arith.addf %148, %150 : vector<1x32xf32>
    %152 = math.rsqrt %151 : vector<1x32xf32>
    %153 = arith.mulf %149, %152 : vector<1x32xf32>
    %c1_132 = arith.constant 1 : index
    %c0_133 = arith.constant 0 : index
    %154 = vector.load %arg6[%c1_132, %c0_133] : memref<2x32xf32, #tpu.memory_space<vmem>>, vector<1x32xf32>
    %155 = arith.mulf %142, %153 : vector<1x32xf32>
    %156 = arith.subf %154, %155 : vector<1x32xf32>
    %157 = vector.broadcast %153 : vector<1x32xf32> to vector<16x32xf32>
    %158 = arith.mulf %86, %157 : vector<16x32xf32>
    %159 = vector.broadcast %156 : vector<1x32xf32> to vector<16x32xf32>
    %160 = arith.addf %158, %159 : vector<16x32xf32>
    %cst_134 = arith.constant 0.000000e+00 : f32
    %161 = vector.broadcast %cst_134 : f32 to vector<16x32xf32>
    %162 = arith.maximumf %160, %161 : vector<16x32xf32>
    %c0_135 = arith.constant 0 : index
    %c8_136 = arith.constant 8 : index
    %c0_137 = arith.constant 0 : index
    %163 = vector.load %arg11[%c0_135, %c8_136, %c0_137] : memref<2x25x32xf32, #tpu.memory_space<vmem>>, vector<1x16x32xf32>
    %164 = vector.shape_cast %163 : vector<1x16x32xf32> to vector<16x32xf32>
    %165 = vector.shape_cast %162 : vector<16x32xf32> to vector<1x16x32xf32>
    tpu.vector_store %arg11[%c0_135, %c8_136, %c0_137], %165 {strides = array<i32>} : memref<2x25x32xf32, #tpu.memory_space<vmem>>, vector<1x16x32xf32>,
    %166 = vector.broadcast %153 : vector<1x32xf32> to vector<16x32xf32>
    %167 = arith.mulf %133, %166 : vector<16x32xf32>
    %168 = vector.broadcast %156 : vector<1x32xf32> to vector<16x32xf32>
    %169 = arith.addf %167, %168 : vector<16x32xf32>
    %cst_138 = arith.constant 0.000000e+00 : f32
    %170 = vector.broadcast %cst_138 : f32 to vector<16x32xf32>
    %171 = arith.maximumf %169, %170 : vector<16x32xf32>
    %c1_139 = arith.constant 1 : index
    %c8_140 = arith.constant 8 : index
    %c0_141 = arith.constant 0 : index
    %172 = vector.load %arg11[%c1_139, %c8_140, %c0_141] : memref<2x25x32xf32, #tpu.memory_space<vmem>>, vector<1x16x32xf32>
    %173 = vector.shape_cast %172 : vector<1x16x32xf32> to vector<16x32xf32>
    %174 = vector.shape_cast %171 : vector<16x32xf32> to vector<1x16x32xf32>
    tpu.vector_store %arg11[%c1_139, %c8_140, %c0_141], %174 {strides = array<i32>} : memref<2x25x32xf32, #tpu.memory_space<vmem>>, vector<1x16x32xf32>,
    %cst_142 = arith.constant 0.000000e+00 : f32
    %175 = vector.broadcast %cst_142 : f32 to vector<1x32xf32>
    %cst_143 = arith.constant 0.000000e+00 : f32
    %176 = vector.broadcast %cst_143 : f32 to vector<1x32xf32>
    %cst_144 = arith.constant 0.000000e+00 : f32
    %177 = vector.broadcast %cst_144 : f32 to vector<16x32xf32>
    %c0_145 = arith.constant 0 : index
    %c7_146 = arith.constant 7 : index
    %c0_147 = arith.constant 0 : index
    %178 = vector.load %arg11[%c0_145, %c7_146, %c0_147] : memref<2x25x32xf32, #tpu.memory_space<vmem>>, vector<1x16x32xf32>
    %179 = vector.shape_cast %178 : vector<1x16x32xf32> to vector<16x32xf32>
    %180 = arith.truncf %179 : vector<16x32xf32> to vector<16x32xbf16>
    %c0_148 = arith.constant 0 : index
    %c0_149 = arith.constant 0 : index
    %c0_150 = arith.constant 0 : index
    %181 = vector.load %arg7[%c0_148, %c0_149, %c0_150] : memref<3x32x32xbf16, #tpu.memory_space<vmem>>, vector<1x32x32xbf16>
    %182 = vector.shape_cast %181 : vector<1x32x32xbf16> to vector<32x32xbf16>
    %cst_151 = arith.constant dense<0.000000e+00> : vector<16x32xf32>
    %183 = tpu.matmul %180, %182, %cst_151 {dimension_numbers = #tpu.dot_dimension_numbers<[1], [0], [0], [1], [0, 0, 1, 1], [], []>} : vector<16x32xbf16>, vector<32x32xbf16>, vector<16x32xf32> -> vector<16x32xf32>
    %184 = arith.addf %177, %183 : vector<16x32xf32>
    %c0_152 = arith.constant 0 : index
    %c8_153 = arith.constant 8 : index
    %c0_154 = arith.constant 0 : index
    %185 = vector.load %arg11[%c0_152, %c8_153, %c0_154] : memref<2x25x32xf32, #tpu.memory_space<vmem>>, vector<1x16x32xf32>
    %186 = vector.shape_cast %185 : vector<1x16x32xf32> to vector<16x32xf32>
    %187 = arith.truncf %186 : vector<16x32xf32> to vector<16x32xbf16>
    %c1_155 = arith.constant 1 : index
    %c0_156 = arith.constant 0 : index
    %c0_157 = arith.constant 0 : index
    %188 = vector.load %arg7[%c1_155, %c0_156, %c0_157] : memref<3x32x32xbf16, #tpu.memory_space<vmem>>, vector<1x32x32xbf16>
    %189 = vector.shape_cast %188 : vector<1x32x32xbf16> to vector<32x32xbf16>
    %cst_158 = arith.constant dense<0.000000e+00> : vector<16x32xf32>
    %190 = tpu.matmul %187, %189, %cst_158 {dimension_numbers = #tpu.dot_dimension_numbers<[1], [0], [0], [1], [0, 0, 1, 1], [], []>} : vector<16x32xbf16>, vector<32x32xbf16>, vector<16x32xf32> -> vector<16x32xf32>
    %191 = arith.addf %184, %190 : vector<16x32xf32>
    %c0_159 = arith.constant 0 : index
    %c9_160 = arith.constant 9 : index
    %c0_161 = arith.constant 0 : index
    %192 = vector.load %arg11[%c0_159, %c9_160, %c0_161] : memref<2x25x32xf32, #tpu.memory_space<vmem>>, vector<1x16x32xf32>
    %193 = vector.shape_cast %192 : vector<1x16x32xf32> to vector<16x32xf32>
    %194 = arith.truncf %193 : vector<16x32xf32> to vector<16x32xbf16>
    %c2_162 = arith.constant 2 : index
    %c0_163 = arith.constant 0 : index
    %c0_164 = arith.constant 0 : index
    %195 = vector.load %arg7[%c2_162, %c0_163, %c0_164] : memref<3x32x32xbf16, #tpu.memory_space<vmem>>, vector<1x32x32xbf16>
    %196 = vector.shape_cast %195 : vector<1x32x32xbf16> to vector<32x32xbf16>
    %cst_165 = arith.constant dense<0.000000e+00> : vector<16x32xf32>
    %197 = tpu.matmul %194, %196, %cst_165 {dimension_numbers = #tpu.dot_dimension_numbers<[1], [0], [0], [1], [0, 0, 1, 1], [], []>} : vector<16x32xbf16>, vector<32x32xbf16>, vector<16x32xf32> -> vector<16x32xf32>
    %198 = arith.addf %191, %197 : vector<16x32xf32>
    %cst_166 = arith.constant dense<0.000000e+00> : vector<32xf32>
    %199 = vector.multi_reduction <add>, %198, %cst_166 [0] : vector<16x32xf32> to vector<32xf32>
    %200 = vector.shape_cast %199 : vector<32xf32> to vector<1x32xf32>
    %201 = arith.addf %175, %200 : vector<1x32xf32>
    %202 = arith.mulf %198, %198 : vector<16x32xf32>
    %cst_167 = arith.constant dense<0.000000e+00> : vector<32xf32>
    %203 = vector.multi_reduction <add>, %202, %cst_167 [0] : vector<16x32xf32> to vector<32xf32>
    %204 = vector.shape_cast %203 : vector<32xf32> to vector<1x32xf32>
    %205 = arith.addf %176, %204 : vector<1x32xf32>
    %cst_168 = arith.constant 0.000000e+00 : f32
    %206 = vector.broadcast %cst_168 : f32 to vector<16x32xf32>
    %c1_169 = arith.constant 1 : index
    %c7_170 = arith.constant 7 : index
    %c0_171 = arith.constant 0 : index
    %207 = vector.load %arg11[%c1_169, %c7_170, %c0_171] : memref<2x25x32xf32, #tpu.memory_space<vmem>>, vector<1x16x32xf32>
    %208 = vector.shape_cast %207 : vector<1x16x32xf32> to vector<16x32xf32>
    %209 = arith.truncf %208 : vector<16x32xf32> to vector<16x32xbf16>
    %c0_172 = arith.constant 0 : index
    %c0_173 = arith.constant 0 : index
    %c0_174 = arith.constant 0 : index
    %210 = vector.load %arg7[%c0_172, %c0_173, %c0_174] : memref<3x32x32xbf16, #tpu.memory_space<vmem>>, vector<1x32x32xbf16>
    %211 = vector.shape_cast %210 : vector<1x32x32xbf16> to vector<32x32xbf16>
    %cst_175 = arith.constant dense<0.000000e+00> : vector<16x32xf32>
    %212 = tpu.matmul %209, %211, %cst_175 {dimension_numbers = #tpu.dot_dimension_numbers<[1], [0], [0], [1], [0, 0, 1, 1], [], []>} : vector<16x32xbf16>, vector<32x32xbf16>, vector<16x32xf32> -> vector<16x32xf32>
    %213 = arith.addf %206, %212 : vector<16x32xf32>
    %c1_176 = arith.constant 1 : index
    %c8_177 = arith.constant 8 : index
    %c0_178 = arith.constant 0 : index
    %214 = vector.load %arg11[%c1_176, %c8_177, %c0_178] : memref<2x25x32xf32, #tpu.memory_space<vmem>>, vector<1x16x32xf32>
    %215 = vector.shape_cast %214 : vector<1x16x32xf32> to vector<16x32xf32>
    %216 = arith.truncf %215 : vector<16x32xf32> to vector<16x32xbf16>
    %c1_179 = arith.constant 1 : index
    %c0_180 = arith.constant 0 : index
    %c0_181 = arith.constant 0 : index
    %217 = vector.load %arg7[%c1_179, %c0_180, %c0_181] : memref<3x32x32xbf16, #tpu.memory_space<vmem>>, vector<1x32x32xbf16>
    %218 = vector.shape_cast %217 : vector<1x32x32xbf16> to vector<32x32xbf16>
    %cst_182 = arith.constant dense<0.000000e+00> : vector<16x32xf32>
    %219 = tpu.matmul %216, %218, %cst_182 {dimension_numbers = #tpu.dot_dimension_numbers<[1], [0], [0], [1], [0, 0, 1, 1], [], []>} : vector<16x32xbf16>, vector<32x32xbf16>, vector<16x32xf32> -> vector<16x32xf32>
    %220 = arith.addf %213, %219 : vector<16x32xf32>
    %c1_183 = arith.constant 1 : index
    %c9_184 = arith.constant 9 : index
    %c0_185 = arith.constant 0 : index
    %221 = vector.load %arg11[%c1_183, %c9_184, %c0_185] : memref<2x25x32xf32, #tpu.memory_space<vmem>>, vector<1x16x32xf32>
    %222 = vector.shape_cast %221 : vector<1x16x32xf32> to vector<16x32xf32>
    %223 = arith.truncf %222 : vector<16x32xf32> to vector<16x32xbf16>
    %c2_186 = arith.constant 2 : index
    %c0_187 = arith.constant 0 : index
    %c0_188 = arith.constant 0 : index
    %224 = vector.load %arg7[%c2_186, %c0_187, %c0_188] : memref<3x32x32xbf16, #tpu.memory_space<vmem>>, vector<1x32x32xbf16>
    %225 = vector.shape_cast %224 : vector<1x32x32xbf16> to vector<32x32xbf16>
    %cst_189 = arith.constant dense<0.000000e+00> : vector<16x32xf32>
    %226 = tpu.matmul %223, %225, %cst_189 {dimension_numbers = #tpu.dot_dimension_numbers<[1], [0], [0], [1], [0, 0, 1, 1], [], []>} : vector<16x32xbf16>, vector<32x32xbf16>, vector<16x32xf32> -> vector<16x32xf32>
    %227 = arith.addf %220, %226 : vector<16x32xf32>
    %cst_190 = arith.constant dense<0.000000e+00> : vector<32xf32>
    %228 = vector.multi_reduction <add>, %227, %cst_190 [0] : vector<16x32xf32> to vector<32xf32>
    %229 = vector.shape_cast %228 : vector<32xf32> to vector<1x32xf32>
    %230 = arith.addf %201, %229 : vector<1x32xf32>
    %231 = arith.mulf %227, %227 : vector<16x32xf32>
    %cst_191 = arith.constant dense<0.000000e+00> : vector<32xf32>
    %232 = vector.multi_reduction <add>, %231, %cst_191 [0] : vector<16x32xf32> to vector<32xf32>
    %233 = vector.shape_cast %232 : vector<32xf32> to vector<1x32xf32>
    %234 = arith.addf %205, %233 : vector<1x32xf32>
    %cst_192 = arith.constant 3.125000e-02 : f32
    %235 = vector.broadcast %cst_192 : f32 to vector<1x32xf32>
    %236 = arith.mulf %230, %235 : vector<1x32xf32>
    %cst_193 = arith.constant 3.125000e-02 : f32
    %237 = vector.broadcast %cst_193 : f32 to vector<1x32xf32>
    %238 = arith.mulf %234, %237 : vector<1x32xf32>
    %239 = arith.mulf %236, %236 : vector<1x32xf32>
    %240 = arith.subf %238, %239 : vector<1x32xf32>
    %cst_194 = arith.constant 0.000000e+00 : f32
    %241 = vector.broadcast %cst_194 : f32 to vector<1x32xf32>
    %242 = arith.maximumf %240, %241 : vector<1x32xf32>
    %c0_195 = arith.constant 0 : index
    %c0_196 = arith.constant 0 : index
    %243 = vector.load %arg8[%c0_195, %c0_196] : memref<2x32xf32, #tpu.memory_space<vmem>>, vector<1x32xf32>
    %cst_197 = arith.constant 9.99999974E-6 : f32
    %244 = vector.broadcast %cst_197 : f32 to vector<1x32xf32>
    %245 = arith.addf %242, %244 : vector<1x32xf32>
    %246 = math.rsqrt %245 : vector<1x32xf32>
    %247 = arith.mulf %243, %246 : vector<1x32xf32>
    %c1_198 = arith.constant 1 : index
    %c0_199 = arith.constant 0 : index
    %248 = vector.load %arg8[%c1_198, %c0_199] : memref<2x32xf32, #tpu.memory_space<vmem>>, vector<1x32xf32>
    %249 = arith.mulf %236, %247 : vector<1x32xf32>
    %250 = arith.subf %248, %249 : vector<1x32xf32>
    %251 = vector.broadcast %247 : vector<1x32xf32> to vector<16x32xf32>
    %252 = arith.mulf %198, %251 : vector<16x32xf32>
    %253 = vector.broadcast %250 : vector<1x32xf32> to vector<16x32xf32>
    %254 = arith.addf %252, %253 : vector<16x32xf32>
    %cst_200 = arith.constant 0.000000e+00 : f32
    %255 = vector.broadcast %cst_200 : f32 to vector<16x32xf32>
    %256 = arith.maximumf %254, %255 : vector<16x32xf32>
    %c0_201 = arith.constant 0 : index
    %c0_202 = arith.constant 0 : index
    %c0_203 = arith.constant 0 : index
    %257 = vector.load %arg9[%c0_201, %c0_202, %c0_203] : memref<2x16x32xf32, #tpu.memory_space<vmem>>, vector<1x16x32xf32>
    %258 = vector.shape_cast %257 : vector<1x16x32xf32> to vector<16x32xf32>
    %259 = vector.shape_cast %256 : vector<16x32xf32> to vector<1x16x32xf32>
    tpu.vector_store %arg9[%c0_201, %c0_202, %c0_203], %259 {strides = array<i32>} : memref<2x16x32xf32, #tpu.memory_space<vmem>>, vector<1x16x32xf32>,
    %260 = vector.broadcast %247 : vector<1x32xf32> to vector<16x32xf32>
    %261 = arith.mulf %227, %260 : vector<16x32xf32>
    %262 = vector.broadcast %250 : vector<1x32xf32> to vector<16x32xf32>
    %263 = arith.addf %261, %262 : vector<16x32xf32>
    %cst_204 = arith.constant 0.000000e+00 : f32
    %264 = vector.broadcast %cst_204 : f32 to vector<16x32xf32>
    %265 = arith.maximumf %263, %264 : vector<16x32xf32>
    %c1_205 = arith.constant 1 : index
    %c0_206 = arith.constant 0 : index
    %c0_207 = arith.constant 0 : index
    %266 = vector.load %arg9[%c1_205, %c0_206, %c0_207] : memref<2x16x32xf32, #tpu.memory_space<vmem>>, vector<1x16x32xf32>
    %267 = vector.shape_cast %266 : vector<1x16x32xf32> to vector<16x32xf32>
    %268 = vector.shape_cast %265 : vector<16x32xf32> to vector<1x16x32xf32>
    tpu.vector_store %arg9[%c1_205, %c0_206, %c0_207], %268 {strides = array<i32>} : memref<2x16x32xf32, #tpu.memory_space<vmem>>, vector<1x16x32xf32>,
    return
  }
}

</mosaic_0001>

<bundles_post_ra>
// kernel: up_1d_forward.1
= control target key start
LH: loop header
LB: loop body
LE: loop exit
PB: predicated region body
PF: predicated region fallthrough
CT: control target
= control target key end

     0   :  { %v2172_v1 = vmov 0.0   ;;  %vm2173_vm0 = vmmov 0   ;;  %vm96_vm1 = vcmask 523264   ;;  %s2637_s0 = inlined_call_operand.vmem [shape: bf16[2,18,32], index: 0, kind: input, shape index: {}]   ;;  %s2638_s1 = inlined_call_operand.vmem [shape: bf16[2,16,64], index: 1, kind: input, shape index: {}]   ;;  %s2639_s2 = inlined_call_operand.vmem [shape: bf16[2,64,32], index: 2, kind: input, shape index: {}]   ;;  %s2640_s3 = inlined_call_operand.vmem [shape: f32[1,32], index: 3, kind: input, shape index: {}]   ;;  %s2641_s4 = inlined_call_operand.vmem [shape: bf16[3,32,32], index: 4, kind: input, shape index: {}]   ;;  %s2642_s5 = inlined_call_operand.vmem [shape: bf16[3,32,32], index: 5, kind: input, shape index: {}]   ;;  %s2643_s6 = inlined_call_operand.vmem [shape: f32[2,32], index: 6, kind: input, shape index: {}]   ;;  %s2644_s7 = inlined_call_operand.vmem [shape: bf16[3,32,32], index: 7, kind: input, shape index: {}]   ;;  %s2645_s8 = inlined_call_operand.vmem [shape: f32[2,32], index: 8, kind: input, shape index: {}]   ;;  %s2646_s9 = inlined_call_operand.hbm [shape: f32[2,16,32], index: 9, kind: output, shape index: {}]  }
   0x1   :  { %v2101_v0 = vld [vmem:[%s2639_s2] sm:$0xff]   ;;  %1848 = vmatprep.subr.bf16.mxu0 %v2172_v1  ;;  %1860 = vmatprep.subr.bf16.mxu1 %v2172_v1  ;;  %v2103_v3 = vld [vmem:[%s2639_s2 + $0x8] sm:$0xff]   ;;  %v2105_v5 = vld [vmem:[%s2639_s2 + $0x10] sm:$0xff]  }
   0x2   :  { %v2102_v2 = vld [vmem:[%s2639_s2 + $0x20] sm:$0xff]   ;;  %1849 = vmatpush3.bf16.msra.mxu0 %v2101_v0  ;;  %1856 = vmatprep.mubr.msk.bf16.mxu0 %vm2173_vm0, %v2172_v1  ;;  %v2104_v4 = vld [vmem:[%s2639_s2 + $0x28] sm:$0xff]   ;;  %v2106_v6 = vld [vmem:[%s2639_s2 + $0x30] sm:$0xff]  }
   0x3   :  { %1861 = vmatpush3.bf16.msra.mxu1 %v2102_v2  ;;  %1850 = vmatprep.subr.bf16.mxu0 %v2172_v1  ;;  %v2107_v7 = vld [vmem:[%s2639_s2 + $0x18] sm:$0xff]   ;;  %v2109_v9 = vld [vmem:[%s2638_s1] sm:$0xff]   ;;  %v2112_v12 = vld [vmem:[%s2639_s2 + $0x8] sm:$0xff]  }
   0x4   :  { %1862 = vmatprep.subr.bf16.mxu1 %v2172_v1  ;;  %1868 = vmatprep.mubr.msk.bf16.mxu1 %vm2173_vm0, %v2172_v1  ;;  %v2108_v8 = vld [vmem:[%s2639_s2 + $0x38] sm:$0xff]   ;;  %v2110_v10 = vld [vmem:[%s2639_s2] sm:$0xff]   ;;  %v2113_v13 = vld [vmem:[%s2639_s2 + $0x28] sm:$0xff]  }
   0x5   :  { %v2111_v11 = vld [vmem:[%s2639_s2 + $0x20] sm:$0xff]   ;;  %v2114_v14 = vld [vmem:[%s2639_s2 + $0x10] sm:$0xff]   ;;  %v2116_v16 = vld [vmem:[%s2639_s2 + $0x18] sm:$0xff]  }
   0x6   :  { %1851 = vmatpush3.bf16.msra.mxu0 %v2103_v3  ;;  %v2115_v15 = vld [vmem:[%s2639_s2 + $0x30] sm:$0xff]   ;;  %v2117_v17 = vld [vmem:[%s2639_s2 + $0x38] sm:$0xff]   ;;  %v2118_v18 = vld [vmem:[%s2638_s1 + $0x8] sm:$0xff]  }
   0x7   :  { %1863 = vmatpush3.bf16.msra.mxu1 %v2104_v4  ;;  %1852 = vmatprep.subr.bf16.mxu0 %v2172_v1 }
   0x8   :  { %1864 = vmatprep.subr.bf16.mxu1 %v2172_v1 }
   0xa   :  { %1853 = vmatpush3.bf16.msra.mxu0 %v2105_v5 }
   0xb   :  { %1865 = vmatpush3.bf16.msra.mxu1 %v2106_v6  ;;  %1854 = vmatprep.subr.bf16.mxu0 %v2172_v1 }
   0xc   :  { %1866 = vmatprep.subr.bf16.mxu1 %v2172_v1 }
   0xe   :  { %1855 = vmatpush3.bf16.msra.mxu0 %v2107_v7 }
   0xf   :  { %1867 = vmatpush3.bf16.msra.mxu1 %v2108_v8  ;;  %1872 = vmatprep.subr.bf16.mxu0 %v2172_v1 }
  0x10   :  { %1884 = vmatprep.subr.bf16.mxu1 %v2172_v1 }
  0x11   :  { %1857 = vmatmul.mubr.msk.bf16.vlgmr.msra.gmra.mrb[0].mxu0 %vm96_vm1, %v2109_v9 }
  0x12   :  { %1869 = vmatmul.mubr.msk.bf16.vlgmr.msra.gmra.mrb[0].mxu1 %vm96_vm1, %v2109_v9  ;;  %1873 = vmatpush3.bf16.msra.mxu0 %v2110_v10 }
  0x13   :  { %1885 = vmatpush3.bf16.msra.mxu1 %v2111_v11  ;;  %1874 = vmatprep.subr.bf16.mxu0 %v2172_v1 }
  0x14   :  { %1886 = vmatprep.subr.bf16.mxu1 %v2172_v1  ;;  %1880 = vmatprep.mubr.msk.bf16.mxu0 %vm2173_vm0, %v2172_v1 }
  0x15   :  { %1892 = vmatprep.mubr.msk.bf16.mxu1 %vm2173_vm0, %v2172_v1 }
  0x16   :  { %1875 = vmatpush3.bf16.msra.mxu0 %v2112_v12 }
  0x17   :  { %1887 = vmatpush3.bf16.msra.mxu1 %v2113_v13  ;;  %1876 = vmatprep.subr.bf16.mxu0 %v2172_v1 }
  0x18   :  { %1888 = vmatprep.subr.bf16.mxu1 %v2172_v1 }
  0x1a   :  { %1877 = vmatpush3.bf16.msra.mxu0 %v2114_v14 }
  0x1b   :  { %1889 = vmatpush3.bf16.msra.mxu1 %v2115_v15  ;;  %1878 = vmatprep.subr.bf16.mxu0 %v2172_v1 }
  0x1c   :  { %1890 = vmatprep.subr.bf16.mxu1 %v2172_v1 }
  0x1e   :  { %1879 = vmatpush3.bf16.msra.mxu0 %v2116_v16 }
  0x1f   :  { %1891 = vmatpush3.bf16.msra.mxu1 %v2117_v17  ;;  %1896 = vmatprep.subr.bf16.mxu0 %v2172_v1 }
  0x20   :  { %1944 = vmatprep.subr.bf16.mxu1 %v2172_v1 }
  0x21   :  { %14 = vsyncpa [#allocation5], 0  ;;  %1881 = vmatmul.mubr.msk.bf16.vlgmr.msra.gmra.mrb[4].mxu0 %vm96_vm1, %v2118_v18  ;;  %vm34_vm2 = vcmask 261120   ;;  %vm38_vm3 = vcmask 253952   ;;  %v2119_v19 = vld [vmem:[%s2642_s5] sm:$0xff]   ;;  %v2120_v20 = vld [vmem:[%s2642_s5 + $0x8] sm:$0xff]   ;;  %v52_v21 = vlaneseq }
  0x22   :  { %1893 = vmatmul.mubr.msk.bf16.vlgmr.msra.gmra.mrb[4].mxu1 %vm96_vm1, %v2118_v18  ;;  %1900 = vmatprep.mubr.msk.bf16.mxu0 %vm2173_vm0, %v2172_v1  ;;  %36 = vst.msk [vmem:[#allocation2 + $0x8] sm:$0xff] %vm34_vm2, %v2172_v1  ;;  %35 = vst.msk [vmem:[#allocation2] sm:$0xff] %vm34_vm2, %v2172_v1  ;;  %v1677_v28 = vld [vmem:[%s2640_s3] ss:$0 sm:$0xff]  ;;  %v2122_v51 = vld [vmem:[%s2641_s4 + $0x8] sm:$0xff]   ;;  %vm697_vm7 = vcmask 1046528  }
  0x23   :  { %1948 = vmatprep.mubr.msk.bf16.mxu1 %vm2173_vm0, %v2172_v1  ;;  %37 = vst.msk [vmem:[#allocation2 + $0x10] sm:$0xff] %vm34_vm2, %v2172_v1  ;;  %40 = vst.msk [vmem:[#allocation2 + $0x20] sm:$0xff] %vm34_vm2, %v2172_v1  ;;  %1897 = vmatpush3.bf16.msra.mxu0 %v2119_v19  ;;  %v2353_v22 = vshrl.u32 %v52_v21, 7  ;;  %v2121_v43 = vld [vmem:[%s2641_s4] sm:$0xff]   ;;  %v2124_v62 = vld [vmem:[%s2641_s4 + $0x10] sm:$0xff]   ;;  %s2174_s13 = smov [#allocation4]  }
  0x24   :  { %41 = vst.msk [vmem:[#allocation2 + $0x28] sm:$0xff] %vm34_vm2, %v2172_v1  ;;  %42 = vst.msk [vmem:[#allocation2 + $0x30] sm:$0xff] %vm34_vm2, %v2172_v1  ;;  %1945 = vmatpush3.bf16.msra.mxu1 %v2119_v19  ;;  %1898 = vmatprep.subr.bf16.mxu0 %v2172_v1  ;;  %v535_v55 = vld [vmem:[%s2637_s0] sm:$0xf]  ;;  %v2392_v56 = vld [vmem:[%s2637_s0 + $0x4] sm:$0xf] }
  0x25   :  { %44 = vst.msk [vmem:[#allocation3] sm:$0xff] %vm34_vm2, %v2172_v1  ;;  %45 = vst.msk [vmem:[#allocation3 + $0x8] sm:$0xff] %vm34_vm2, %v2172_v1  ;;  %1946 = vmatprep.subr.bf16.mxu1 %v2172_v1  ;;  %v54_v23 = vadd.s32 8, %v2353_v22  ;;  %v55_v24 = vand.u32 1, %v2353_v22  ;;  %v1711_v60 = vcombine.low %v535_v55, %v2392_v56  ;;  %v2123_v61 = vld [vmem:[%s2637_s0] sm:$0xff]   ;;  %v2125_v4 = vld [vmem:[%s2641_s4 + $0x18] sm:$0xff]  }
  0x26   :  { %46 = vst.msk [vmem:[#allocation3 + $0x10] sm:$0xff] %vm34_vm2, %v2172_v1  ;;  %48 = vst.msk [vmem:[#allocation3 + $0x20] sm:$0xff] %vm34_vm2, %v2172_v1  ;;  %v2409_v63 = vld [vmem:[%s2637_s0 + $0x8] ss:$0 sps:$4 sm:$0x11]   ;;  %v2129_v14 = vld [vmem:[%s2642_s5 + $0x10] sm:$0xff]  }
  0x27   :  { %49 = vst.msk [vmem:[#allocation3 + $0x28] sm:$0xff] %vm34_vm2, %v2172_v1  ;;  %50 = vst.msk [vmem:[#allocation3 + $0x30] sm:$0xff] %vm34_vm2, %v2172_v1  ;;  %1899 = vmatpush3.bf16.msra.mxu0 %v2120_v20  ;;  %v56_v25 = vand.u32 1, %v54_v23  ;;  %vm2357_vm4 = vcmp.eq.s32.totalorder %v55_v24, 0  ;;  %v555_v0 = vshll.u32 %v1711_v60, 16  ;;  %v553_v5 = vshrl.u32 %v1711_v60, 16 }
  0x28   :  { %39 = vst.msk [vmem:[#allocation2 + $0x18] sm:$0x1] %vm38_vm3, %v2172_v1  ;;  %43 = vst.msk [vmem:[#allocation2 + $0x38] sm:$0x1] %vm38_vm3, %v2172_v1  ;;  %1947 = vmatpush3.bf16.msra.mxu1 %v2120_v20  ;;  %1904 = vmatprep.subr.bf16.mxu0 %v2172_v1  ;;  %v560_v7 = vshll.u32 %v2409_v63, 16  ;;  %v2128_v16 = vld [vmem:[%s2637_s0 + $0xc] sm:$0xff]  }
  0x29   :  { %47 = vst.msk [vmem:[#allocation3 + $0x18] sm:$0x1] %vm38_vm3, %v2172_v1  ;;  %51 = vst.msk [vmem:[#allocation3 + $0x38] sm:$0x1] %vm38_vm3, %v2172_v1  ;;  %1952 = vmatprep.subr.bf16.mxu1 %v2172_v1  ;;  %vm2364_vm5 = vcmp.eq.s32.totalorder %v56_v25, 0  ;;  %v557_v6 = vrot.slane %v555_v0, 1 }
  0x2a   :  { %v562_v10 = vrot.slane %v560_v7, 1  ;;  %vm551_vm6 = vsmask.f32 7424  ;;  %v1743_v11 = vld [vmem:[%s2637_s0 + $0xc] sm:$0xf]  ;;  %v2130_v17 = vld [vmem:[%s2642_s5 + $0x18] sm:$0xff]  }
  0x2b   :  { %v558_v9 = vor.u32 %v557_v6, %v553_v5  ;;  %v2429_v12 = vld [vmem:[%s2637_s0 + $0x10] sm:$0xf]  ;;  %v2450_v18 = vld [vmem:[%s2637_s0 + $0x14] ss:$0 sps:$4 sm:$0x11]   ;;  %s1647_s14 = sshll.u32 %s2174_s13, 4  ;;  %s1648_s14 = int_to_ptr.vmem [resolvable:$true] %s1647_s14 }
  0x2c   :  { %v1746_v15 = vcombine.low %v1743_v11, %v2429_v12  ;;  %v965_v23 = vshll.u32 %v2450_v18, 16  ;;  %p2153_p1 = scmp.lt.s32.totalorder %s1648_s14, %s1648_s14 }
  0x2d   :  { %v563_v13 = vsel %vm551_vm6, %v558_v9, %v562_v10 }
  0x2e   :  { %v960_v19 = vshll.u32 %v1746_v15, 16  ;;  %v958_v20 = vshrl.u32 %v1746_v15, 16 }
  0x30   :  { %v962_v21 = vrot.slane %v960_v19, 1 }
  0x32   :  { %v963_v26 = vor.u32 %v962_v21, %v958_v20 }
  0xe4   :  { %v134_v27 = vpop.f32.mrb[0].mxu0 }
  0xe5   :  { %v208_v29 = vpop.f32.mrb[0].mxu1  ;;  %v1858_v30 = vpop.f32.mrb[1].mxu0 }
  0xe6   :  { %v221_v32 = vsel %vm2357_vm4, %v134_v27, %v208_v29  ;;  %v1870_v33 = vpop.f32.mrb[1].mxu1  ;;  %v137_v34 = vpop.f32.mrb[2].mxu0  ;;  %v967_v27 = vrot.slane %v965_v23, 1  ;;  %v688_v30 = vld [vmem:[%s2637_s0] sm:$0xe] }
  0xe7   :  { %v230_v35 = vadd.f32 %v1677_v28, %v221_v32  ;;  %v211_v36 = vpop.f32.mrb[2].mxu1  ;;  %v1859_v37 = vpop.f32.mrb[3].mxu0  ;;  %v2134_v32 = vld [vmem:[%s2641_s4 + $0x28] sm:$0xff]   ;;  %v1727_v33 = vcombine.low %v688_v30, %v2392_v56 }
  0xe8   :  { %v222_v38 = vsel %vm2364_vm5, %v137_v34, %v211_v36  ;;  %v1871_v39 = vpop.f32.mrb[3].mxu1  ;;  %v968_v31 = vsel %vm551_vm6, %v963_v26, %v967_v27  ;;  %v2136_v37 = vld [vmem:[%s2642_s5 + $0x20] sm:$0xff]  }
  0xe9   :  { %232 = vst.msk [vmem:[#allocation2 + $0x8] sm:$0xff] %vm34_vm2, %v230_v35  ;;  %v231_v40 = vadd.f32 %v1677_v28, %v222_v38  ;;  %v698_v34 = vrot.slane %v1727_v33, 1  ;;  %v699_v35 = vrot.slane %v2409_v63, 1 }
  0xeb   :  { %233 = vst.msk [vmem:[#allocation2 + $0x10] sm:$0xff] %vm34_vm2, %v231_v40  ;;  %v700_v36 = vsel %vm697_vm7, %v698_v34, %v699_v35  ;;  %v2137_v40 = vld [vmem:[%s2642_s5 + $0x28] sm:$0xff]  }
  0xf0   :  { %v411_v41 = vld [vmem:[#allocation2 + $0x7] sm:$0xff] }
  0xf1   :  { %v622_v24 = vld [vmem:[#allocation2 + $0x8] sm:$0xff] }
  0xf2   :  { %v412_v42 = vld [vmem:[#allocation2 + $0xf] sm:$0xff] }
  0xf3   :  { %v413_v44 = vpack.c.bf16 %v412_v42, %v411_v41  ;;  %v623_v25 = vld [vmem:[#allocation2 + $0x10] sm:$0xff]  ;;  %v1750_v42 = vld [vmem:[%s2637_s0 + $0xc] sm:$0xe] }
  0xf4   :  { %v311_v45 = vpop.f32.mrb[4].mxu0  ;;  %v624_v29 = vpack.c.bf16 %v623_v25, %v622_v24 }
  0xf5   :  { %v384_v46 = vpop.f32.mrb[4].mxu1  ;;  %1901 = vmatmul.mubr.msk.bf16.vlgmr.msra.gmra.mrb[8].mxu0 %vm34_vm2, %v413_v44  ;;  %v1882_v47 = vpop.f32.mrb[5].mxu0  ;;  %v759_v44 = vld [vmem:[#allocation2 + $0x9] sm:$0xff] }
  0xf6   :  { %v391_v48 = vsel %vm2357_vm4, %v311_v45, %v384_v46  ;;  %v1894_v49 = vpop.f32.mrb[5].mxu1  ;;  %v314_v50 = vpop.f32.mrb[6].mxu0  ;;  %1905 = vmatpush3.bf16.msra.mxu0 %v2121_v43  ;;  %1908 = vmatprep.mubr.msk.bf16.mxu0 %vm2173_vm0, %v2172_v1  ;;  %v760_v45 = vld [vmem:[#allocation2 + $0x11] sm:$0xff]  ;;  %v1069_v47 = vrot.slane %v2450_v18, 1 }
  0xf7   :  { %v400_v52 = vadd.f32 %v1677_v28, %v391_v48  ;;  %v387_v53 = vpop.f32.mrb[6].mxu1  ;;  %v1883_v54 = vpop.f32.mrb[7].mxu0  ;;  %1906 = vmatprep.subr.bf16.mxu0 %v2172_v1  ;;  %v761_v48 = vpack.c.bf16 %v760_v45, %v759_v44 }
  0xf8   :  { %v392_v57 = vsel %vm2364_vm5, %v314_v50, %v387_v53  ;;  %v1895_v58 = vpop.f32.mrb[7].mxu1  ;;  %v2138_v53 = vld [vmem:[%s2644_s7 + $0x10] sm:$0xff]   ;;  %v2139_v54 = vld [vmem:[%s2644_s7 + $0x18] sm:$0xff]  }
  0xf9   :  { %403 = vst.msk [vmem:[#allocation2 + $0x28] sm:$0xff] %vm34_vm2, %v400_v52  ;;  %v401_v59 = vadd.f32 %v1677_v28, %v392_v57  ;;  %v2133_v28 = vld [vmem:[%s2641_s4 + $0x20] sm:$0xff]  }
  0xfa   :  { %1907 = vmatpush3.bf16.msra.mxu0 %v2122_v51 }
  0xfb   :  { %404 = vst.msk [vmem:[#allocation2 + $0x30] sm:$0xff] %vm34_vm2, %v401_v59  ;;  %1912 = vmatprep.subr.bf16.mxu0 %v2172_v1 }
 0x100   :  { %v850_v2 = vld [vmem:[#allocation2 + $0x27] sm:$0xff] }
 0x101   :  { %1909 = vmatmul.mubr.msk.bf16.vlgmr.msra.gmra.mrb[8].mxu0 %vm34_vm2, %v2123_v61  ;;  %v1015_v39 = vld [vmem:[#allocation2 + $0x28] sm:$0xff] }
 0x102   :  { %v851_v3 = vld [vmem:[#allocation2 + $0x2f] sm:$0xff]  ;;  %1913 = vmatpush3.bf16.msra.mxu0 %v2124_v62  ;;  %1916 = vmatprep.mubr.msk.bf16.mxu0 %vm2173_vm0, %v2172_v1 }
 0x103   :  { %v852_v8 = vpack.c.bf16 %v851_v3, %v850_v2  ;;  %1914 = vmatprep.subr.bf16.mxu0 %v2172_v1  ;;  %v1016_v38 = vld [vmem:[#allocation2 + $0x30] sm:$0xff] }
 0x104   :  { %v1017_v41 = vpack.c.bf16 %v1016_v38, %v1015_v39  ;;  %v1117_v50 = vld [vmem:[#allocation2 + $0x29] sm:$0xff] }
 0x105   :  { %1949 = vmatmul.mubr.msk.bf16.vlgmr.msra.gmra.mrb[8].mxu1 %vm34_vm2, %v852_v8 }
 0x106   :  { %1953 = vmatpush3.bf16.msra.mxu1 %v2121_v43  ;;  %1915 = vmatpush3.bf16.msra.mxu0 %v2125_v4  ;;  %v1751_v43 = vcombine.low %v1750_v42, %v2429_v12 }
 0x107   :  { %1954 = vmatprep.subr.bf16.mxu1 %v2172_v1  ;;  %1956 = vmatprep.mubr.msk.bf16.mxu1 %vm2173_vm0, %v2172_v1 }
 0x108   :  { %1920 = vmatprep.subr.bf16.mxu0 %v2172_v1  ;;  %v1068_v46 = vrot.slane %v1751_v43, 1 }
 0x10a   :  { %1955 = vmatpush3.bf16.msra.mxu1 %v2122_v51  ;;  %v1070_v49 = vsel %vm697_vm7, %v1068_v46, %v1069_v47  ;;  %v1118_v51 = vld [vmem:[#allocation2 + $0x31] sm:$0xff] }
 0x10b   :  { %1960 = vmatprep.subr.bf16.mxu1 %v2172_v1  ;;  %v1119_v52 = vpack.c.bf16 %v1118_v51, %v1117_v50  ;;  %v2548_v50 = vsub.s32 0, %v2353_v22 }
 0x10d   :  { %1917 = vmatmul.mubr.msk.bf16.vlgmr.msra.gmra.mrb[8].mxu0 %vm34_vm2, %v563_v13 }
 0x10e   :  { %1921 = vmatpush3.bf16.msra.mxu0 %v2129_v14  ;;  %1924 = vmatprep.mubr.msk.bf16.mxu0 %vm2173_vm0, %v2172_v1 }
 0x10f   :  { %1922 = vmatprep.subr.bf16.mxu0 %v2172_v1 }
 0x111   :  { %1957 = vmatmul.mubr.msk.bf16.vlgmr.msra.gmra.mrb[8].mxu1 %vm34_vm2, %v2128_v16 }
 0x112   :  { %1961 = vmatpush3.bf16.msra.mxu1 %v2124_v62  ;;  %1923 = vmatpush3.bf16.msra.mxu0 %v2130_v17 }
 0x113   :  { %1962 = vmatprep.subr.bf16.mxu1 %v2172_v1  ;;  %1964 = vmatprep.mubr.msk.bf16.mxu1 %vm2173_vm0, %v2172_v1 }
 0x114   :  { %1928 = vmatprep.subr.bf16.mxu0 %v2172_v1 }
 0x116   :  { %1963 = vmatpush3.bf16.msra.mxu1 %v2125_v4 }
 0x117   :  { %1968 = vmatprep.subr.bf16.mxu1 %v2172_v1 }
 0x119   :  { %1925 = vmatmul.mubr.msk.bf16.vlgmr.msra.gmra.mrb[8].mxu0 %vm34_vm2, %v624_v29 }
 0x11a   :  { %1929 = vmatpush3.bf16.msra.mxu0 %v2133_v28  ;;  %1932 = vmatprep.mubr.msk.bf16.mxu0 %vm2173_vm0, %v2172_v1 }
 0x11b   :  { %1930 = vmatprep.subr.bf16.mxu0 %v2172_v1 }
 0x11d   :  { %1965 = vmatmul.mubr.msk.bf16.vlgmr.msra.gmra.mrb[8].mxu1 %vm34_vm2, %v968_v31 }
 0x11e   :  { %1969 = vmatpush3.bf16.msra.mxu1 %v2129_v14  ;;  %1931 = vmatpush3.bf16.msra.mxu0 %v2134_v32 }
 0x11f   :  { %1970 = vmatprep.subr.bf16.mxu1 %v2172_v1  ;;  %1972 = vmatprep.mubr.msk.bf16.mxu1 %vm2173_vm0, %v2172_v1 }
 0x120   :  { %1936 = vmatprep.subr.bf16.mxu0 %v2172_v1 }
 0x122   :  { %1971 = vmatpush3.bf16.msra.mxu1 %v2130_v17 }
 0x123   :  { %1976 = vmatprep.subr.bf16.mxu1 %v2172_v1 }
 0x125   :  { %1933 = vmatmul.mubr.msk.bf16.vlgmr.msra.gmra.mrb[8].mxu0 %vm34_vm2, %v700_v36 }
 0x126   :  { %1937 = vmatpush3.bf16.msra.mxu0 %v2136_v37  ;;  %1940 = vmatprep.mubr.msk.bf16.mxu0 %vm2173_vm0, %v2172_v1 }
 0x127   :  { %1938 = vmatprep.subr.bf16.mxu0 %v2172_v1 }
 0x129   :  { %1973 = vmatmul.mubr.msk.bf16.vlgmr.msra.gmra.mrb[8].mxu1 %vm34_vm2, %v1017_v41 }
 0x12a   :  { %1977 = vmatpush3.bf16.msra.mxu1 %v2133_v28  ;;  %1939 = vmatpush3.bf16.msra.mxu0 %v2137_v40 }
 0x12b   :  { %1978 = vmatprep.subr.bf16.mxu1 %v2172_v1  ;;  %1980 = vmatprep.mubr.msk.bf16.mxu1 %vm2173_vm0, %v2172_v1 }
 0x12c   :  { %1992 = vmatprep.subr.bf16.mxu0 %v2172_v1 }
 0x12e   :  { %1979 = vmatpush3.bf16.msra.mxu1 %v2134_v32 }
 0x12f   :  { %1984 = vmatprep.subr.bf16.mxu1 %v2172_v1 }
 0x131   :  { %1941 = vmatmul.mubr.msk.bf16.vlgmr.msra.gmra.mrb[8].mxu0 %vm34_vm2, %v761_v48 }
 0x132   :  { %1996 = vmatprep.mubr.msk.bf16.mxu0 %vm2173_vm0, %v2172_v1  ;;  %1993 = vmatpush3.bf16.msra.mxu0 %v2138_v53 }
 0x133   :  { %1994 = vmatprep.subr.bf16.mxu0 %v2172_v1 }
 0x135   :  { %1981 = vmatmul.mubr.msk.bf16.vlgmr.msra.gmra.mrb[8].mxu1 %vm34_vm2, %v1070_v49  ;;  %v1193_v49 = vld [vmem:[%s2643_s6] sm:$0x1] }
 0x136   :  { %1985 = vmatpush3.bf16.msra.mxu1 %v2136_v37  ;;  %1988 = vmatprep.mubr.msk.bf16.mxu1 %vm2173_vm0, %v2172_v1 }
 0x137   :  { %1986 = vmatprep.subr.bf16.mxu1 %v2172_v1  ;;  %1995 = vmatpush3.bf16.msra.mxu0 %v2139_v54 }
 0x138   :  { %2000 = vmatprep.subr.bf16.mxu0 %v2172_v1 }
 0x13a   :  { %1987 = vmatpush3.bf16.msra.mxu1 %v2137_v40 }
 0x13b   :  { %2016 = vmatprep.subr.bf16.mxu1 %v2172_v1 }
 0x141   :  { %1989 = vmatmul.mubr.msk.bf16.vlgmr.msra.gmra.mrb[8].mxu1 %vm34_vm2, %v1119_v52 }
 0x142   :  { %2020 = vmatprep.mubr.msk.bf16.mxu1 %vm2173_vm0, %v2172_v1  ;;  %2017 = vmatpush3.bf16.msra.mxu1 %v2138_v53  ;;  %v1197_v53 = vld [vmem:[%s2643_s6 + $0x1] sm:$0x1] }
 0x143   :  { %2018 = vmatprep.subr.bf16.mxu1 %v2172_v1 }
 0x146   :  { %2019 = vmatpush3.bf16.msra.mxu1 %v2139_v54 }
 0x147   :  { %2024 = vmatprep.subr.bf16.mxu1 %v2172_v1 }
 0x204   :  { %v2526_v55 = vpop.f32.mrb[8].mxu0 }
 0x205   :  { %v835_v56 = vmul.f32 %v2526_v55, %v2526_v55  ;;  %v1942_v57 = vpop.f32.mrb[9].mxu0  ;;  %v825_v59 = vsel %vm34_vm2, %v2526_v55, 0.0 }
 0x206   :  { %v2530_v58 = vpop.f32.mrb[10].mxu0 }
 0x207   :  { %v826_v60 = vsel %vm34_vm2, %v2530_v58, 0.0  ;;  %v836_v61 = vmul.f32 %v2530_v58, %v2530_v58  ;;  %v1943_v62 = vpop.f32.mrb[11].mxu0  ;;  %v837_v0 = vsel %vm34_vm2, %v835_v56, 0.0 }
 0x208   :  { %v827_v63 = vadd.f32 %v826_v60, %v825_v59 }
 0x209   :  { %v838_v2 = vsel %vm34_vm2, %v836_v61, 0.0 }
 0x20a   :  { %v839_v3 = vadd.f32 %v838_v2, %v837_v0  ;;  %v828_v4 = vrot.slane %v827_v63, 4 }
 0x20c   :  { %v840_v5 = vrot.slane %v839_v3, 4  ;;  %v829_v6 = vadd.f32 %v828_v4, %v827_v63 }
 0x20e   :  { %v841_v10 = vadd.f32 %v840_v5, %v839_v3  ;;  %v830_v16 = vrot.slane %v829_v6, 2 }
 0x210   :  { %v842_v20 = vrot.slane %v841_v10, 2  ;;  %v831_v24 = vadd.f32 %v830_v16, %v829_v6 }
 0x212   :  { %v843_v27 = vadd.f32 %v842_v20, %v841_v10  ;;  %v832_v30 = vrot.slane %v831_v24, 1 }
 0x214   :  { %v1157_v7 = vpop.f32.mrb[8].mxu1  ;;  %v844_v33 = vrot.slane %v843_v27, 1  ;;  %v833_v36 = vadd.f32 %v832_v30, %v831_v24 }
 0x215   :  { %v1176_v8 = vmul.f32 %v1157_v7, %v1157_v7  ;;  %v1990_v9 = vpop.f32.mrb[9].mxu1  ;;  %v1166_v12 = vsel %vm34_vm2, %v1157_v7, 0.0 }
 0x216   :  { %v1160_v11 = vpop.f32.mrb[10].mxu1  ;;  %v845_v39 = vadd.f32 %v844_v33, %v843_v27 }
 0x217   :  { %v1167_v13 = vsel %vm34_vm2, %v1160_v11, 0.0  ;;  %v1177_v14 = vmul.f32 %v1160_v11, %v1160_v11  ;;  %v1991_v15 = vpop.f32.mrb[11].mxu1  ;;  %v1178_v18 = vsel %vm34_vm2, %v1176_v8, 0.0 }
 0x218   :  { %v1168_v17 = vadd.f32 %v1167_v13, %v1166_v12  ;;  %v2141_v13 = vld [vmem:[%s2644_s7 + $0x8] sm:$0xff]  }
 0x219   :  { %v1179_v19 = vsel %vm34_vm2, %v1177_v14, 0.0 }
 0x21a   :  { %v1169_v21 = vrot.slane %v1168_v17, 4  ;;  %v1180_v23 = vadd.f32 %v1179_v19, %v1178_v18  ;;  %v2142_v18 = vld [vmem:[%s2644_s7 + $0x20] sm:$0xff]  }
 0x21c   :  { %v1170_v25 = vadd.f32 %v1169_v21, %v1168_v17  ;;  %v1181_v26 = vrot.slane %v1180_v23, 4  ;;  %v2143_v21 = vld [vmem:[%s2644_s7 + $0x28] sm:$0xff]  }
 0x21e   :  { %v1171_v28 = vrot.slane %v1170_v25, 2  ;;  %v1182_v29 = vadd.f32 %v1181_v26, %v1180_v23 }
 0x220   :  { %v1172_v31 = vadd.f32 %v1171_v28, %v1170_v25  ;;  %v1183_v32 = vrot.slane %v1182_v29, 2 }
 0x222   :  { %v1173_v34 = vrot.slane %v1172_v31, 1  ;;  %v1184_v35 = vadd.f32 %v1183_v32, %v1182_v29 }
 0x224   :  { %v1174_v37 = vadd.f32 %v1173_v34, %v1172_v31  ;;  %v1185_v38 = vrot.slane %v1184_v35, 1 }
 0x226   :  { %v1175_v40 = vadd.f32 %v1174_v37, %v833_v36  ;;  %v1186_v41 = vadd.f32 %v1185_v38, %v1184_v35 }
 0x228   :  { %v1187_v42 = vadd.f32 %v1186_v41, %v845_v39  ;;  %v1188_v43 = vmul.f32 0.03125, %v1175_v40 }
 0x22a   :  { %v1189_v44 = vmul.f32 0.03125, %v1187_v42  ;;  %v1190_v45 = vmul.f32 %v1188_v43, %v1188_v43 }
 0x22c   :  { %v1191_v46 = vsub.f32 %v1189_v44, %v1190_v45 }
 0x22e   :  { %v1192_v47 = vmax.f32 %v1191_v46, 0.0 }
 0x230   :  { %v1194_v48 = vadd.f32 1e-05, %v1192_v47 }
 0x232   :  { %2144 = vrsqrt.f32 %v1194_v48 }
 0x23c   :  { %v2145_v51 = vpop.eup %2144 }
 0x23d   :  { %v1196_v52 = vmul.f32 %v2145_v51, %v1193_v49 }
 0x23f   :  { %v1198_v54 = vmul.f32 %v1196_v52, %v1188_v43  ;;  %v1203_v56 = vrot.slane %v1196_v52, %v2548_v50 }
 0x241   :  { %v1199_v57 = vsub.f32 %v1197_v53, %v1198_v54  ;;  %v1204_v59 = vmul.f32 %v1203_v56, %v2526_v55  ;;  %v1205_v60 = vmul.f32 %v1203_v56, %v2530_v58  ;;  %v1216_v61 = vmul.f32 %v1203_v56, %v1157_v7  ;;  %v2140_v55 = vld [vmem:[%s2644_s7] sm:$0xff]  }
 0x242   :  { %v1217_v62 = vmul.f32 %v1203_v56, %v1160_v11 }
 0x243   :  { %v1209_v63 = vrot.slane %v1199_v57, %v2548_v50 }
 0x245   :  { %v1210_v22 = vadd.f32 %v1209_v63, %v1204_v59  ;;  %v1211_v0 = vadd.f32 %v1209_v63, %v1205_v60  ;;  %v1218_v2 = vadd.f32 %v1216_v61, %v1209_v63  ;;  %v1219_v3 = vadd.f32 %v1217_v62, %v1209_v63 }
 0x247   :  { %v1212_v4 = vmax.f32 %v1210_v22, 0.0  ;;  %v1213_v5 = vmax.f32 %v1211_v0, 0.0  ;;  %v1220_v6 = vmax.f32 %v1218_v2, 0.0  ;;  %v1221_v8 = vmax.f32 %v1219_v3, 0.0 }
 0x249   :  { %1214 = vst.msk [vmem:[#allocation3 + $0x8] sm:$0xff] %vm34_vm2, %v1212_v4  ;;  %1215 = vst.msk [vmem:[#allocation3 + $0x10] sm:$0xff] %vm34_vm2, %v1213_v5 }
 0x24a   :  { %1223 = vst.msk [vmem:[#allocation3 + $0x28] sm:$0xff] %vm34_vm2, %v1220_v6  ;;  %1224 = vst.msk [vmem:[#allocation3 + $0x30] sm:$0xff] %vm34_vm2, %v1221_v8 }
 0x250   :  { %v1232_v58 = vld [vmem:[#allocation3 + $0x8] sm:$0xff]  ;;  %v1233_v7 = vld [vmem:[#allocation3 + $0x10] sm:$0xff] }
 0x251   :  { %v1443_v9 = vld [vmem:[#allocation3 + $0x28] sm:$0xff]  ;;  %v1234_v10 = vpack.c.bf16 %v1233_v7, %v1232_v58  ;;  %v1444_v11 = vld [vmem:[#allocation3 + $0x30] sm:$0xff] }
 0x252   :  { %v1445_v12 = vpack.c.bf16 %v1444_v11, %v1443_v9  ;;  %v1225_v14 = vld [vmem:[#allocation3 + $0x7] sm:$0xff]  ;;  %v1226_v15 = vld [vmem:[#allocation3 + $0xf] sm:$0xff] }
 0x253   :  { %1997 = vmatmul.mubr.msk.bf16.vlgmr.msra.gmra.mrb[12].mxu0 %vm34_vm2, %v1234_v10  ;;  %v1440_v16 = vld [vmem:[#allocation3 + $0x27] sm:$0xff]  ;;  %v1441_v17 = vld [vmem:[#allocation3 + $0x2f] sm:$0xff]  ;;  %v1227_v19 = vpack.c.bf16 %v1226_v15, %v1225_v14 }
 0x254   :  { %2001 = vmatpush3.bf16.msra.mxu0 %v2140_v55  ;;  %2021 = vmatmul.mubr.msk.bf16.vlgmr.msra.gmra.mrb[12].mxu1 %vm34_vm2, %v1445_v12  ;;  %v1442_v20 = vpack.c.bf16 %v1441_v17, %v1440_v16  ;;  %v1352_v23 = vld [vmem:[#allocation3 + $0x9] sm:$0xff]  ;;  %v1353_v24 = vld [vmem:[#allocation3 + $0x11] sm:$0xff] }
 0x255   :  { %2025 = vmatpush3.bf16.msra.mxu1 %v2140_v55  ;;  %2002 = vmatprep.subr.bf16.mxu0 %v2172_v1  ;;  %v1534_v25 = vld [vmem:[#allocation3 + $0x29] sm:$0xff]  ;;  %v1535_v26 = vld [vmem:[#allocation3 + $0x31] sm:$0xff]  ;;  %v1354_v27 = vpack.c.bf16 %v1353_v24, %v1352_v23 }
 0x256   :  { %2026 = vmatprep.subr.bf16.mxu1 %v2172_v1  ;;  %2004 = vmatprep.mubr.msk.bf16.mxu0 %vm2173_vm0, %v2172_v1  ;;  %v1536_v28 = vpack.c.bf16 %v1535_v26, %v1534_v25  ;;  %v1614_v25 = vld [vmem:[%s2645_s8 + $0x1] sm:$0x1] }
 0x257   :  { %2028 = vmatprep.mubr.msk.bf16.mxu1 %vm2173_vm0, %v2172_v1 }
 0x258   :  { %2003 = vmatpush3.bf16.msra.mxu0 %v2141_v13 }
 0x259   :  { %2027 = vmatpush3.bf16.msra.mxu1 %v2141_v13  ;;  %2008 = vmatprep.subr.bf16.mxu0 %v2172_v1 }
 0x25a   :  { %2032 = vmatprep.subr.bf16.mxu1 %v2172_v1 }
 0x25f   :  { %2005 = vmatmul.mubr.msk.bf16.vlgmr.msra.gmra.mrb[12].mxu0 %vm34_vm2, %v1227_v19 }
 0x260   :  { %2009 = vmatpush3.bf16.msra.mxu0 %v2142_v18  ;;  %2029 = vmatmul.mubr.msk.bf16.vlgmr.msra.gmra.mrb[12].mxu1 %vm34_vm2, %v1442_v20 }
 0x261   :  { %2033 = vmatpush3.bf16.msra.mxu1 %v2142_v18  ;;  %2010 = vmatprep.subr.bf16.mxu0 %v2172_v1 }
 0x262   :  { %2034 = vmatprep.subr.bf16.mxu1 %v2172_v1  ;;  %2012 = vmatprep.mubr.msk.bf16.mxu0 %vm2173_vm0, %v2172_v1 }
 0x263   :  { %2036 = vmatprep.mubr.msk.bf16.mxu1 %vm2173_vm0, %v2172_v1 }
 0x264   :  { %2011 = vmatpush3.bf16.msra.mxu0 %v2143_v21 }
 0x265   :  { %2035 = vmatpush3.bf16.msra.mxu1 %v2143_v21  ;;  %v1610_v21 = vld [vmem:[%s2645_s8] sm:$0x1]  ;;  %s2148_s8 = scalar_lea.vmem %s1648_s14, 512 }
 0x266   :  { %p2149_p0 = scmp.ne.s32.totalorder %s1648_s14, %s2148_s8  ;;  %p2154_p2 = scmp.lt.s32.totalorder %s2148_s8, %s2148_s8 }
 0x268   :  { %p2155_p3 = por %p2154_p2, %p2153_p1 }
 0x26a   :  { %p2156_p4 = pnand %p2155_p3, %p2149_p0 }
 0x26b   :  { %2013 = vmatmul.mubr.msk.bf16.vlgmr.msra.gmra.mrb[12].mxu0 %vm34_vm2, %v1354_v27 }
 0x26c   :  { %2037 = vmatmul.mubr.msk.bf16.vlgmr.msra.gmra.mrb[12].mxu1 %vm34_vm2, %v1536_v28 }
 0x33e   :  { %v2593_v29 = vpop.f32.mrb[12].mxu0 }
 0x33f   :  { %v1428_v30 = vmul.f32 %v2593_v29, %v2593_v29  ;;  %v2597_v31 = vpop.f32.mrb[12].mxu1  ;;  %v2014_v1 = vpop.f32.mrb[13].mxu0  ;;  %v1418_v35 = vsel %vm34_vm2, %v2593_v29, 0.0 }
 0x340   :  { %v1593_v32 = vmul.f32 %v2597_v31, %v2597_v31  ;;  %v2038_v33 = vpop.f32.mrb[13].mxu1  ;;  %v1412_v34 = vpop.f32.mrb[14].mxu0  ;;  %v1583_v40 = vsel %vm34_vm2, %v2597_v31, 0.0 }
 0x341   :  { %v1419_v36 = vsel %vm34_vm2, %v1412_v34, 0.0  ;;  %v1429_v37 = vmul.f32 %v1412_v34, %v1412_v34  ;;  %v1577_v38 = vpop.f32.mrb[14].mxu1  ;;  %v2015_v39 = vpop.f32.mrb[15].mxu0  ;;  %v1430_v45 = vsel %vm34_vm2, %v1428_v30, 0.0 }
 0x342   :  { %v1420_v41 = vadd.f32 %v1419_v36, %v1418_v35  ;;  %v1584_v42 = vsel %vm34_vm2, %v1577_v38, 0.0  ;;  %v1594_v43 = vmul.f32 %v1577_v38, %v1577_v38  ;;  %v2039_v44 = vpop.f32.mrb[15].mxu1  ;;  %v1595_v48 = vsel %vm34_vm2, %v1593_v32, 0.0 }
 0x343   :  { %v1431_v46 = vsel %vm34_vm2, %v1429_v37, 0.0  ;;  %v1585_v47 = vadd.f32 %v1584_v42, %v1583_v40 }
 0x344   :  { %v1421_v49 = vrot.slane %v1420_v41, 4  ;;  %v1432_v51 = vadd.f32 %v1431_v46, %v1430_v45  ;;  %v1596_v52 = vsel %vm34_vm2, %v1594_v43, 0.0 }
 0x345   :  { %v1586_v53 = vrot.slane %v1585_v47, 4  ;;  %v1597_v54 = vadd.f32 %v1596_v52, %v1595_v48 }
 0x346   :  { %v1422_v56 = vadd.f32 %v1421_v49, %v1420_v41  ;;  %v1433_v57 = vrot.slane %v1432_v51, 4 }
 0x347   :  { %v1587_v59 = vadd.f32 %v1586_v53, %v1585_v47  ;;  %v1598_v60 = vrot.slane %v1597_v54, 4 }
 0x348   :  { %v1423_v61 = vrot.slane %v1422_v56, 2  ;;  %v1434_v62 = vadd.f32 %v1433_v57, %v1432_v51 }
 0x349   :  { %v1588_v63 = vrot.slane %v1587_v59, 2  ;;  %v1599_v22 = vadd.f32 %v1598_v60, %v1597_v54 }
 0x34a   :  { %v1424_v0 = vadd.f32 %v1423_v61, %v1422_v56  ;;  %v1435_v2 = vrot.slane %v1434_v62, 2 }
 0x34b   :  { %v1589_v3 = vadd.f32 %v1588_v63, %v1587_v59  ;;  %v1600_v4 = vrot.slane %v1599_v22, 2 }
 0x34c   :  { %v1425_v5 = vrot.slane %v1424_v0, 1  ;;  %v1436_v6 = vadd.f32 %v1435_v2, %v1434_v62 }
 0x34d   :  { %v1590_v8 = vrot.slane %v1589_v3, 1  ;;  %v1601_v55 = vadd.f32 %v1600_v4, %v1599_v22 }
 0x34e   :  { %v1426_v58 = vadd.f32 %v1425_v5, %v1424_v0  ;;  %v1437_v7 = vrot.slane %v1436_v6, 1 }
 0x34f   :  { %v1591_v9 = vadd.f32 %v1590_v8, %v1589_v3  ;;  %v1602_v10 = vrot.slane %v1601_v55, 1 }
 0x350   :  { %v1438_v11 = vadd.f32 %v1437_v7, %v1436_v6 }
 0x351   :  { %v1592_v12 = vadd.f32 %v1591_v9, %v1426_v58  ;;  %v1603_v13 = vadd.f32 %v1602_v10, %v1601_v55 }
 0x353   :  { %v1604_v14 = vadd.f32 %v1603_v13, %v1438_v11  ;;  %v1605_v15 = vmul.f32 0.03125, %v1592_v12 }
 0x355   :  { %v1606_v16 = vmul.f32 0.03125, %v1604_v14  ;;  %v1607_v17 = vmul.f32 %v1605_v15, %v1605_v15 }
 0x357   :  { %v1608_v18 = vsub.f32 %v1606_v16, %v1607_v17 }
 0x359   :  { %v1609_v19 = vmax.f32 %v1608_v18, 0.0 }
 0x35b   :  { %v1611_v20 = vadd.f32 1e-05, %v1609_v19 }
 0x35d   :  { %2146 = vrsqrt.f32 %v1611_v20 }
 0x367   :  { %v2147_v23 = vpop.eup %2146 }
 0x368   :  { %v1613_v24 = vmul.f32 %v2147_v23, %v1610_v21 }
 0x36a   :  { %v1615_v26 = vmul.f32 %v1613_v24, %v1605_v15  ;;  %v1620_v27 = vrot.slane %v1613_v24, %v2548_v50 }
 0x36c   :  { %v1616_v28 = vsub.f32 %v1614_v25, %v1615_v26  ;;  %v1621_v30 = vmul.f32 %v1620_v27, %v2593_v29  ;;  %v1622_v1 = vmul.f32 %v1620_v27, %v1412_v34  ;;  %v1633_v32 = vmul.f32 %v1620_v27, %v2597_v31 }
 0x36d   :  { %v1634_v33 = vmul.f32 %v1620_v27, %v1577_v38 }
 0x36e   :  { %v1626_v35 = vrot.slane %v1616_v28, %v2548_v50 }
 0x370   :  { %v1636_v36 = vadd.f32 %v1634_v33, %v1626_v35  ;;  %v1627_v37 = vadd.f32 %v1626_v35, %v1621_v30  ;;  %v1628_v39 = vadd.f32 %v1626_v35, %v1622_v1  ;;  %v1635_v40 = vadd.f32 %v1633_v32, %v1626_v35 }
 0x372   :  { %v1638_v41 = vmax.f32 %v1636_v36, 0.0  ;;  %v1629_v42 = vmax.f32 %v1627_v37, 0.0  ;;  %v1630_v43 = vmax.f32 %v1628_v39, 0.0  ;;  %v1637_v44 = vmax.f32 %v1635_v40, 0.0 }
 0x374   :  { %1641 = vst.msk [vmem:[#allocation4 + $0x18] sm:$0xff] %vm34_vm2, %v1638_v41  ;;  %1631 = vst.msk [vmem:[#allocation4] sm:$0xff] %vm34_vm2, %v1629_v42 }
 0x375   :  { %1632 = vst.msk [vmem:[#allocation4 + $0x8] sm:$0xff] %vm34_vm2, %v1630_v43  ;;  %1640 = vst.msk [vmem:[#allocation4 + $0x10] sm:$0xff] %vm34_vm2, %v1637_v44 }
 0x376   :  { %2159 = shalt.err (!%p2156_p4)
}
 0x377   :  { %s2160_s16 = scalar_lea.hbm %s2646_s9, 512 }
 0x378   :  { %p2161_p5 = scmp.ne.s32.totalorder %s2646_s9, %s2160_s16  ;;  %p2164_p6 = scmp.lt.u32.totalorder %s2160_s16, %s2646_s9 }
 0x37a   :  { %p2166_p7 = pnand %p2164_p6, %p2161_p5 }
 0x37c   :  { %2169 = shalt.err (!%p2166_p7)
}
 0x37d   :  { %s2175_s0 = smov 128   ;;  %s2176_s5 = smov 8  }
 0x37e   :  { %1653 = dma.vmem_to_hbm [thread:$0]  %s1648_s14, 512, %s2646_s9, [#allocation5], %s2175_s0, %s2175_s0, %s2176_s5  }
 0x37f   :  { %2170 = dma.done.wait [#allocation5], 512  }
 0x380   :  { %2171 = vsyncadd [#allocation5], 4294966784 }
 0x381   :  { %1657 = vsyncpa [#allocation5], 1 }

</bundles_post_ra>
